<compile_context>
chip_gen: v6e
topology: v6e:2x2x1
jax: 0.10.0
libtpu: 0.0.40
codegen_flags: <defaults>
</compile_context>

<pallas_src>
import functools

import jax
import jax.numpy as jnp
from jax.experimental import pallas as pl
from jax.experimental.pallas import tpu as pltpu


# ----------------------------------------------------------------------------
# Kernel: per (batch-block, time-chunk) grid step, run T_chunk serial LSTM steps
# for both layers.  h/c carries persist in VMEM scratch across time chunks.
# ----------------------------------------------------------------------------
def _sentiment_lstm_kernel(xproj_ref,                 # (T_chunk, B_blk, 4H) bf16: X@W_ih0 + b0
                           whh0_ref,                  # (H, 4H) bf16
                           wih1_ref, whh1_ref,        # (H, 4H) bf16 each
                           b1_ref,                    # (1, 4H) f32
                           wl_ref, bl_ref,            # (1, H), (1, 1) f32
                           h0_ref, c0_ref,            # (2, B_blk, H) f32 initial hidden
                           sig_ref, hn_ref, cn_ref,   # outputs
                           h_sc, c_sc):               # (2, B_blk, H) f32 scratch carries
    t_idx = pl.program_id(1)
    n_t = pl.num_programs(1)
    T_chunk = xproj_ref.shape[0]
    H = h0_ref.shape[-1]

    # Load initial hidden state into the persistent carry at the first time chunk.
    @pl.when(t_idx == 0)
    def _():
        h_sc[...] = h0_ref[...]
        c_sc[...] = c0_ref[...]

    # Hoisted small loads (weights are read inside the dots; MXU path handles them).
    b1 = b1_ref[...]                                   # (1, 4H) f32

    def gates_to_hc(gates, c_prev):
        # Gate column order is (i, f, o, g): sigmoid on the contiguous 3H slab, tanh on H.
        sig_slab = jax.nn.sigmoid(gates[:, :3 * H])
        i_g = sig_slab[:, 0 * H:1 * H]
        f_g = sig_slab[:, 1 * H:2 * H]
        o_g = sig_slab[:, 2 * H:3 * H]
        g_g = jnp.tanh(gates[:, 3 * H:4 * H])
        c_new = f_g * c_prev + i_g * g_g
        h_new = o_g * jnp.tanh(c_new)
        return h_new, c_new

    def body(t, carry):
        h0, c0, h1, c1 = carry
        # Layer 0: input projection (incl. bias) precomputed; only h->h dot on the serial path.
        gates0 = (xproj_ref[t].astype(jnp.float32)
                  + jnp.dot(h0.astype(whh0_ref.dtype), whh0_ref[...],
                            preferred_element_type=jnp.float32))
        h0, c0 = gates_to_hc(gates0, c0)
        # Layer 1: two narrow dots (no lane-axis concat).  Inter-layer dropout is identity
        # in eval mode, as is the module's nn.Dropout.
        gates1 = (jnp.dot(h0.astype(wih1_ref.dtype), wih1_ref[...],
                          preferred_element_type=jnp.float32)
                  + jnp.dot(h1.astype(whh1_ref.dtype), whh1_ref[...],
                            preferred_element_type=jnp.float32)
                  + b1)
        h1, c1 = gates_to_hc(gates1, c1)
        return h0, c0, h1, c1

    init = (h_sc[0], c_sc[0], h_sc[1], c_sc[1])
    unroll = min(T_chunk, 8)                           # partial unroll: ILP-visible, no blow-up
    h0f, c0f, h1f, c1f = jax.lax.fori_loop(0, T_chunk, body, init, unroll=unroll)

    # Persist carries for the next time chunk.
    h_sc[0] = h0f
    h_sc[1] = h1f
    c_sc[0] = c0f
    c_sc[1] = c1f

    # Epilogue at the last time chunk: sigmoid(Linear(h_last)) as VPU mul + lane reduce,
    # plus final (h_n, c_n) writeback.
    @pl.when(t_idx == n_t - 1)
    def _():
        logits = jnp.sum(h1f * wl_ref[...], axis=-1, keepdims=True) + bl_ref[...]   # (B, 1)
        sig_ref[...] = jax.nn.sigmoid(logits)
        hn_ref[0] = h0f
        hn_ref[1] = h1f
        cn_ref[0] = c0f
        cn_ref[1] = c1f


# ----------------------------------------------------------------------------
# Wrapper: embedding gather + hoisted X@W_ih0 projection (plain XLA) + pallas_call.
# ----------------------------------------------------------------------------
def _largest_divisor_leq(n, cap):
    best = 1
    for d in range(1, n + 1):
        if n % d == 0 and d <= cap:
            best = d
    return best


def sentiment_rnn_forward(params, x_ids, hidden):
    """x_ids: (B, T) int32 token ids. hidden: (h0, c0), each (2, B, H).
    Returns (sig_out (B,), (h_n, c_n))  — eval-mode forward of SentimentRNN."""
    h0_all, c0_all = hidden
    B, T = x_ids.shape
    H = h0_all.shape[-1]

    # Pad batch to the sublane multiple (8); padded rows are sliced off at the end.
    B_pad = max(8, ((B + 7) // 8) * 8)
    pad = B_pad - B
    if pad:
        x_ids = jnp.pad(x_ids, ((0, pad), (0, 0)))
        h0_all = jnp.pad(h0_all, ((0, 0), (0, pad), (0, 0)))
        c0_all = jnp.pad(c0_all, ((0, 0), (0, pad), (0, 0)))

    # Embedding gather, time-major, bf16 activations (large-vocab gather stays in XLA).
    x_tm = jnp.take(params["embed"], x_ids.T, axis=0).astype(jnp.bfloat16)   # (T, B_pad, E)
    E = x_tm.shape[-1]

    # Hoisted layer-0 input projection: one big (T*B, E) @ (E, 4H) matmul, bias folded in,
    # shipped to the kernel as bf16 (halves HBM->VMEM DMA bytes of the streamed operand).
    xproj = jnp.dot(x_tm.reshape(T * B_pad, E), params["w_ih0"],
                    preferred_element_type=jnp.float32) + params["b0"]
    xproj = xproj.reshape(T, B_pad, 4 * H).astype(jnp.bfloat16)

    # Tiling: batch axis "parallel" (megacore on v7x), time axis "arbitrary" (serial carry).
    B_blk = 8
    T_chunk = _largest_divisor_leq(T, 64)
    grid = (B_pad // B_blk, T // T_chunk)

    const_map = lambda b, t: (0, 0)
    sig, h_n, c_n = pl.pallas_call(
        _sentiment_lstm_kernel,
        out_shape=[
            jax.ShapeDtypeStruct((B_pad, 1), jnp.float32),
            jax.ShapeDtypeStruct((2, B_pad, H), jnp.float32),
            jax.ShapeDtypeStruct((2, B_pad, H), jnp.float32),
        ],
        grid_spec=pltpu.PrefetchScalarGridSpec(
            num_scalar_prefetch=0,
            grid=grid,
            in_specs=[
                pl.BlockSpec((T_chunk, B_blk, 4 * H), lambda b, t: (t, b, 0)),  # xproj stream
                pl.BlockSpec((H, 4 * H), const_map),                            # W_hh0
                pl.BlockSpec((H, 4 * H), const_map),                            # W_ih1
                pl.BlockSpec((H, 4 * H), const_map),                            # W_hh1
                pl.BlockSpec((1, 4 * H), const_map),                            # b1
                pl.BlockSpec((1, H), const_map),                                # w_lin
                pl.BlockSpec((1, 1), const_map),                                # b_lin
                pl.BlockSpec((2, B_blk, H), lambda b, t: (0, b, 0)),            # h0
                pl.BlockSpec((2, B_blk, H), lambda b, t: (0, b, 0)),            # c0
            ],
            out_specs=[
                pl.BlockSpec((B_blk, 1), lambda b, t: (b, 0)),                  # sigmoid out
                pl.BlockSpec((2, B_blk, H), lambda b, t: (0, b, 0)),            # h_n
                pl.BlockSpec((2, B_blk, H), lambda b, t: (0, b, 0)),            # c_n
            ],
            scratch_shapes=[
                pltpu.VMEM((2, B_blk, H), jnp.float32),                         # h carry
                pltpu.VMEM((2, B_blk, H), jnp.float32),                         # c carry
            ],
        ),
        compiler_params=pltpu.CompilerParams(
            dimension_semantics=("parallel", "arbitrary")),
    )(xproj,
      params["w_hh0"], params["w_ih1"], params["w_hh1"], params["b1"],
      params["w_lin"], params["b_lin"],
      h0_all, c0_all)

    return sig[:B, 0], (h_n[:, :B], c_n[:, :B])


# ----------------------------------------------------------------------------
# Deterministic parameter init (PyTorch-like uniform(-1/sqrt(H), 1/sqrt(H))).
# LSTM weights stored pre-transposed, bf16, with gate columns ordered (i, f, o, g).
# Loading real nn.LSTM weights would require permuting columns from (i, f, g, o).
# ----------------------------------------------------------------------------
def init_params(key, vocab_size, embedding_dim, hidden_dim, output_size):
    assert output_size == 1, "classifier epilogue assumes output_size == 1"
    ks = jax.random.split(key, 12)
    k = 1.0 / jnp.sqrt(jnp.float32(hidden_dim))

    def u(kk, shape):
        return jax.random.uniform(kk, shape, jnp.float32, -k, k)

    E, H = embedding_dim, hidden_dim
    params = {
        "embed": jax.random.normal(ks[0], (vocab_size, E), jnp.float32),
        # Layer 0: W_ih used in the hoisted XLA projection, W_hh inside the kernel.
        "w_ih0": u(ks[1], (E, 4 * H)).astype(jnp.bfloat16),
        "w_hh0": u(ks[2], (H, 4 * H)).astype(jnp.bfloat16),
        "b0": u(ks[3], (1, 4 * H)) + u(ks[4], (1, 4 * H)),         # b_ih0 + b_hh0
        # Layer 1 (both dots inside the kernel).
        "w_ih1": u(ks[5], (H, 4 * H)).astype(jnp.bfloat16),
        "w_hh1": u(ks[6], (H, 4 * H)).astype(jnp.bfloat16),
        "b1": u(ks[7], (1, 4 * H)) + u(ks[8], (1, 4 * H)),         # b_ih1 + b_hh1
        # Classifier as a row vector for the VPU-reduce epilogue.
        "w_lin": u(ks[9], (1, H)),
        "b_lin": u(ks[10], (1, 1)),
    }
    return params


if __name__ == "__main__":
    # Small shapes consistent with the module's forward.
    vocab_size = 64
    embedding_dim = 32
    hidden_dim = 32
    n_layers = 2
    output_size = 1
    batch = 2
    seq_len = 8

    key = jax.random.PRNGKey(0)
    k_par, k_x = jax.random.split(key)

    params = init_params(k_par, vocab_size, embedding_dim, hidden_dim, output_size)
    x_ids = jax.random.randint(k_x, (batch, seq_len), 0, vocab_size, dtype=jnp.int32)

    # init_hidden: zeros of shape (n_layers, batch, hidden_dim)
    h0 = jnp.zeros((n_layers, batch, hidden_dim), jnp.float32)
    c0 = jnp.zeros((n_layers, batch, hidden_dim), jnp.float32)

    fwd = jax.jit(functools.partial(sentiment_rnn_forward, params))
    sig_out, (h_n, c_n) = fwd(x_ids, (h0, c0))
    jax.block_until_ready((sig_out, h_n, c_n))

    assert sig_out.shape == (batch,)
    assert h_n.shape == (n_layers, batch, hidden_dim)
    assert c_n.shape == (n_layers, batch, hidden_dim)
    assert bool(jnp.all((sig_out >= 0.0) & (sig_out <= 1.0)))
    assert bool(jnp.all(jnp.isfinite(h_n))) and bool(jnp.all(jnp.isfinite(c_n)))
    print("KERNEL_OK")
</pallas_src>

<mosaic_0001>
module attributes {stable_mosaic.version = 11 : i64} {
  func.func @_sentiment_lstm_kernel(%arg0: i32, %arg1: i32, %arg2: memref<8x8x128xbf16, #tpu.memory_space<vmem>>, %arg3: memref<32x128xbf16, #tpu.memory_space<vmem>>, %arg4: memref<32x128xbf16, #tpu.memory_space<vmem>>, %arg5: memref<32x128xbf16, #tpu.memory_space<vmem>>, %arg6: memref<1x128xf32, #tpu.memory_space<vmem>>, %arg7: memref<1x32xf32, #tpu.memory_space<vmem>>, %arg8: memref<1x1xf32, #tpu.memory_space<vmem>>, %arg9: memref<2x8x32xf32, #tpu.memory_space<vmem>>, %arg10: memref<2x8x32xf32, #tpu.memory_space<vmem>>, %arg11: memref<8x1xf32, #tpu.memory_space<vmem>>, %arg12: memref<2x8x32xf32, #tpu.memory_space<vmem>>, %arg13: memref<2x8x32xf32, #tpu.memory_space<vmem>>, %arg14: memref<2x8x32xf32, #tpu.memory_space<vmem>>, %arg15: memref<2x8x32xf32, #tpu.memory_space<vmem>>) attributes {dimension_semantics = [#tpu.dimension_semantics<parallel>, #tpu.dimension_semantics<arbitrary>], iteration_bounds = array<i64: 1, 1>, scalar_prefetch = 0 : i64, scratch_operands = 2 : i64, tpu.core_type = #tpu.core_type<tc>, window_params = [{transform_indices = @transform_0, window_bounds = array<i64: 8, 8, 128>}, {pipeline_mode = #tpu.pipeline_mode<synchronous>, transform_indices = @transform_1, window_bounds = array<i64: 32, 128>}, {pipeline_mode = #tpu.pipeline_mode<synchronous>, transform_indices = @transform_2, window_bounds = array<i64: 32, 128>}, {pipeline_mode = #tpu.pipeline_mode<synchronous>, transform_indices = @transform_3, window_bounds = array<i64: 32, 128>}, {pipeline_mode = #tpu.pipeline_mode<synchronous>, transform_indices = @transform_4, window_bounds = array<i64: 1, 128>}, {pipeline_mode = #tpu.pipeline_mode<synchronous>, transform_indices = @transform_5, window_bounds = array<i64: 1, 32>}, {pipeline_mode = #tpu.pipeline_mode<synchronous>, transform_indices = @transform_6, window_bounds = array<i64: 1, 1>}, {transform_indices = @transform_7, window_bounds = array<i64: 2, 8, 32>}, {transform_indices = @transform_8, window_bounds = array<i64: 2, 8, 32>}, {transform_indices = @transform_9, window_bounds = array<i64: 8, 1>}, {transform_indices = @transform_10, window_bounds = array<i64: 2, 8, 32>}, {transform_indices = @transform_11, window_bounds = array<i64: 2, 8, 32>}]} {
    %c0_i32 = arith.constant 0 : i32
    %0 = arith.cmpi eq, %arg1, %c0_i32 : i32
    %1 = arith.extui %0 : i1 to i32
    %c0_i32_0 = arith.constant 0 : i32
    %2 = arith.cmpi ne, %1, %c0_i32_0 : i32
    scf.if %2 {
      %c0_131 = arith.constant 0 : index
      %c0_132 = arith.constant 0 : index
      %c0_133 = arith.constant 0 : index
      %419 = vector.load %arg9[%c0_131, %c0_132, %c0_133] : memref<2x8x32xf32, #tpu.memory_space<vmem>>, vector<2x8x32xf32>
      %c0_134 = arith.constant 0 : index
      %c0_135 = arith.constant 0 : index
      %c0_136 = arith.constant 0 : index
      %420 = vector.load %arg14[%c0_134, %c0_135, %c0_136] : memref<2x8x32xf32, #tpu.memory_space<vmem>>, vector<2x8x32xf32>
      tpu.vector_store %arg14[%c0_134, %c0_135, %c0_136], %419 {strides = array<i32>} : memref<2x8x32xf32, #tpu.memory_space<vmem>>, vector<2x8x32xf32>,
      %c0_137 = arith.constant 0 : index
      %c0_138 = arith.constant 0 : index
      %c0_139 = arith.constant 0 : index
      %421 = vector.load %arg10[%c0_137, %c0_138, %c0_139] : memref<2x8x32xf32, #tpu.memory_space<vmem>>, vector<2x8x32xf32>
      %c0_140 = arith.constant 0 : index
      %c0_141 = arith.constant 0 : index
      %c0_142 = arith.constant 0 : index
      %422 = vector.load %arg15[%c0_140, %c0_141, %c0_142] : memref<2x8x32xf32, #tpu.memory_space<vmem>>, vector<2x8x32xf32>
      tpu.vector_store %arg15[%c0_140, %c0_141, %c0_142], %421 {strides = array<i32>} : memref<2x8x32xf32, #tpu.memory_space<vmem>>, vector<2x8x32xf32>,
    } else {
    }
    %c0 = arith.constant 0 : index
    %c0_1 = arith.constant 0 : index
    %3 = vector.load %arg6[%c0, %c0_1] : memref<1x128xf32, #tpu.memory_space<vmem>>, vector<1x128xf32>
    %c0_2 = arith.constant 0 : index
    %c0_3 = arith.constant 0 : index
    %c0_4 = arith.constant 0 : index
    %4 = vector.load %arg14[%c0_2, %c0_3, %c0_4] : memref<2x8x32xf32, #tpu.memory_space<vmem>>, vector<1x8x32xf32>
    %5 = vector.shape_cast %4 : vector<1x8x32xf32> to vector<8x32xf32>
    %c0_5 = arith.constant 0 : index
    %c0_6 = arith.constant 0 : index
    %c0_7 = arith.constant 0 : index
    %6 = vector.load %arg15[%c0_5, %c0_6, %c0_7] : memref<2x8x32xf32, #tpu.memory_space<vmem>>, vector<1x8x32xf32>
    %7 = vector.shape_cast %6 : vector<1x8x32xf32> to vector<8x32xf32>
    %c1 = arith.constant 1 : index
    %c0_8 = arith.constant 0 : index
    %c0_9 = arith.constant 0 : index
    %8 = vector.load %arg14[%c1, %c0_8, %c0_9] : memref<2x8x32xf32, #tpu.memory_space<vmem>>, vector<1x8x32xf32>
    %9 = vector.shape_cast %8 : vector<1x8x32xf32> to vector<8x32xf32>
    %c1_10 = arith.constant 1 : index
    %c0_11 = arith.constant 0 : index
    %c0_12 = arith.constant 0 : index
    %10 = vector.load %arg15[%c1_10, %c0_11, %c0_12] : memref<2x8x32xf32, #tpu.memory_space<vmem>>, vector<1x8x32xf32>
    %11 = vector.shape_cast %10 : vector<1x8x32xf32> to vector<8x32xf32>
    %c0_i32_13 = arith.constant 0 : i32
    %12 = arith.index_cast %c0_i32_13 : i32 to index
    %c0_14 = arith.constant 0 : index
    %c0_15 = arith.constant 0 : index
    %13 = vector.load %arg2[%12, %c0_14, %c0_15] : memref<8x8x128xbf16, #tpu.memory_space<vmem>>, vector<1x8x128xbf16>
    %14 = vector.shape_cast %13 : vector<1x8x128xbf16> to vector<8x128xbf16>
    %15 = arith.extf %14 : vector<8x128xbf16> to vector<8x128xf32>
    %16 = arith.truncf %5 : vector<8x32xf32> to vector<8x32xbf16>
    %c0_16 = arith.constant 0 : index
    %c0_17 = arith.constant 0 : index
    %17 = vector.load %arg3[%c0_16, %c0_17] : memref<32x128xbf16, #tpu.memory_space<vmem>>, vector<32x128xbf16>
    %cst = arith.constant dense<0.000000e+00> : vector<8x128xf32>
    %18 = tpu.matmul %16, %17, %cst {dimension_numbers = #tpu.dot_dimension_numbers<[1], [0], [0], [1], [0, 0, 1, 1], [], []>} : vector<8x32xbf16>, vector<32x128xbf16>, vector<8x128xf32> -> vector<8x128xf32>
    %19 = arith.addf %15, %18 : vector<8x128xf32>
    %20 = vector.extract_strided_slice %19 {offsets = [0, 0], sizes = [8, 96], strides = [1, 1]} : vector<8x128xf32> to vector<8x96xf32>
    %21 = arith.negf %20 : vector<8x96xf32>
    %22 = math.exp %21 : vector<8x96xf32>
    %cst_18 = arith.constant 1.000000e+00 : f32
    %23 = vector.broadcast %cst_18 : f32 to vector<8x96xf32>
    %24 = arith.addf %23, %22 : vector<8x96xf32>
    %25 = arith.divf %23, %24 : vector<8x96xf32>
    %26 = vector.extract_strided_slice %25 {offsets = [0, 0], sizes = [8, 32], strides = [1, 1]} : vector<8x96xf32> to vector<8x32xf32>
    %27 = vector.extract_strided_slice %25 {offsets = [0, 32], sizes = [8, 32], strides = [1, 1]} : vector<8x96xf32> to vector<8x32xf32>
    %28 = vector.extract_strided_slice %25 {offsets = [0, 64], sizes = [8, 32], strides = [1, 1]} : vector<8x96xf32> to vector<8x32xf32>
    %29 = vector.extract_strided_slice %19 {offsets = [0, 96], sizes = [8, 32], strides = [1, 1]} : vector<8x128xf32> to vector<8x32xf32>
    %30 = math.tanh %29 : vector<8x32xf32>
    %31 = arith.mulf %27, %7 : vector<8x32xf32>
    %32 = arith.mulf %26, %30 : vector<8x32xf32>
    %33 = arith.addf %31, %32 : vector<8x32xf32>
    %34 = math.tanh %33 : vector<8x32xf32>
    %35 = arith.mulf %28, %34 : vector<8x32xf32>
    %36 = arith.truncf %35 : vector<8x32xf32> to vector<8x32xbf16>
    %c0_19 = arith.constant 0 : index
    %c0_20 = arith.constant 0 : index
    %37 = vector.load %arg4[%c0_19, %c0_20] : memref<32x128xbf16, #tpu.memory_space<vmem>>, vector<32x128xbf16>
    %cst_21 = arith.constant dense<0.000000e+00> : vector<8x128xf32>
    %38 = tpu.matmul %36, %37, %cst_21 {dimension_numbers = #tpu.dot_dimension_numbers<[1], [0], [0], [1], [0, 0, 1, 1], [], []>} : vector<8x32xbf16>, vector<32x128xbf16>, vector<8x128xf32> -> vector<8x128xf32>
    %39 = arith.truncf %9 : vector<8x32xf32> to vector<8x32xbf16>
    %c0_22 = arith.constant 0 : index
    %c0_23 = arith.constant 0 : index
    %40 = vector.load %arg5[%c0_22, %c0_23] : memref<32x128xbf16, #tpu.memory_space<vmem>>, vector<32x128xbf16>
    %cst_24 = arith.constant dense<0.000000e+00> : vector<8x128xf32>
    %41 = tpu.matmul %39, %40, %cst_24 {dimension_numbers = #tpu.dot_dimension_numbers<[1], [0], [0], [1], [0, 0, 1, 1], [], []>} : vector<8x32xbf16>, vector<32x128xbf16>, vector<8x128xf32> -> vector<8x128xf32>
    %42 = arith.addf %38, %41 : vector<8x128xf32>
    %43 = vector.broadcast %3 : vector<1x128xf32> to vector<8x128xf32>
    %44 = arith.addf %42, %43 : vector<8x128xf32>
    %45 = vector.extract_strided_slice %44 {offsets = [0, 0], sizes = [8, 96], strides = [1, 1]} : vector<8x128xf32> to vector<8x96xf32>
    %46 = arith.negf %45 : vector<8x96xf32>
    %47 = math.exp %46 : vector<8x96xf32>
    %cst_25 = arith.constant 1.000000e+00 : f32
    %48 = vector.broadcast %cst_25 : f32 to vector<8x96xf32>
    %49 = arith.addf %48, %47 : vector<8x96xf32>
    %50 = arith.divf %48, %49 : vector<8x96xf32>
    %51 = vector.extract_strided_slice %50 {offsets = [0, 0], sizes = [8, 32], strides = [1, 1]} : vector<8x96xf32> to vector<8x32xf32>
    %52 = vector.extract_strided_slice %50 {offsets = [0, 32], sizes = [8, 32], strides = [1, 1]} : vector<8x96xf32> to vector<8x32xf32>
    %53 = vector.extract_strided_slice %50 {offsets = [0, 64], sizes = [8, 32], strides = [1, 1]} : vector<8x96xf32> to vector<8x32xf32>
    %54 = vector.extract_strided_slice %44 {offsets = [0, 96], sizes = [8, 32], strides = [1, 1]} : vector<8x128xf32> to vector<8x32xf32>
    %55 = math.tanh %54 : vector<8x32xf32>
    %56 = arith.mulf %52, %11 : vector<8x32xf32>
    %57 = arith.mulf %51, %55 : vector<8x32xf32>
    %58 = arith.addf %56, %57 : vector<8x32xf32>
    %59 = math.tanh %58 : vector<8x32xf32>
    %60 = arith.mulf %53, %59 : vector<8x32xf32>
    %c1_i32 = arith.constant 1 : i32
    %61 = arith.index_cast %c1_i32 : i32 to index
    %c0_26 = arith.constant 0 : index
    %c0_27 = arith.constant 0 : index
    %62 = vector.load %arg2[%61, %c0_26, %c0_27] : memref<8x8x128xbf16, #tpu.memory_space<vmem>>, vector<1x8x128xbf16>
    %63 = vector.shape_cast %62 : vector<1x8x128xbf16> to vector<8x128xbf16>
    %64 = arith.extf %63 : vector<8x128xbf16> to vector<8x128xf32>
    %65 = arith.truncf %35 : vector<8x32xf32> to vector<8x32xbf16>
    %c0_28 = arith.constant 0 : index
    %c0_29 = arith.constant 0 : index
    %66 = vector.load %arg3[%c0_28, %c0_29] : memref<32x128xbf16, #tpu.memory_space<vmem>>, vector<32x128xbf16>
    %cst_30 = arith.constant dense<0.000000e+00> : vector<8x128xf32>
    %67 = tpu.matmul %65, %66, %cst_30 {dimension_numbers = #tpu.dot_dimension_numbers<[1], [0], [0], [1], [0, 0, 1, 1], [], []>} : vector<8x32xbf16>, vector<32x128xbf16>, vector<8x128xf32> -> vector<8x128xf32>
    %68 = arith.addf %64, %67 : vector<8x128xf32>
    %69 = vector.extract_strided_slice %68 {offsets = [0, 0], sizes = [8, 96], strides = [1, 1]} : vector<8x128xf32> to vector<8x96xf32>
    %70 = arith.negf %69 : vector<8x96xf32>
    %71 = math.exp %70 : vector<8x96xf32>
    %cst_31 = arith.constant 1.000000e+00 : f32
    %72 = vector.broadcast %cst_31 : f32 to vector<8x96xf32>
    %73 = arith.addf %72, %71 : vector<8x96xf32>
    %74 = arith.divf %72, %73 : vector<8x96xf32>
    %75 = vector.extract_strided_slice %74 {offsets = [0, 0], sizes = [8, 32], strides = [1, 1]} : vector<8x96xf32> to vector<8x32xf32>
    %76 = vector.extract_strided_slice %74 {offsets = [0, 32], sizes = [8, 32], strides = [1, 1]} : vector<8x96xf32> to vector<8x32xf32>
    %77 = vector.extract_strided_slice %74 {offsets = [0, 64], sizes = [8, 32], strides = [1, 1]} : vector<8x96xf32> to vector<8x32xf32>
    %78 = vector.extract_strided_slice %68 {offsets = [0, 96], sizes = [8, 32], strides = [1, 1]} : vector<8x128xf32> to vector<8x32xf32>
    %79 = math.tanh %78 : vector<8x32xf32>
    %80 = arith.mulf %76, %33 : vector<8x32xf32>
    %81 = arith.mulf %75, %79 : vector<8x32xf32>
    %82 = arith.addf %80, %81 : vector<8x32xf32>
    %83 = math.tanh %82 : vector<8x32xf32>
    %84 = arith.mulf %77, %83 : vector<8x32xf32>
    %85 = arith.truncf %84 : vector<8x32xf32> to vector<8x32xbf16>
    %c0_32 = arith.constant 0 : index
    %c0_33 = arith.constant 0 : index
    %86 = vector.load %arg4[%c0_32, %c0_33] : memref<32x128xbf16, #tpu.memory_space<vmem>>, vector<32x128xbf16>
    %cst_34 = arith.constant dense<0.000000e+00> : vector<8x128xf32>
    %87 = tpu.matmul %85, %86, %cst_34 {dimension_numbers = #tpu.dot_dimension_numbers<[1], [0], [0], [1], [0, 0, 1, 1], [], []>} : vector<8x32xbf16>, vector<32x128xbf16>, vector<8x128xf32> -> vector<8x128xf32>
    %88 = arith.truncf %60 : vector<8x32xf32> to vector<8x32xbf16>
    %c0_35 = arith.constant 0 : index
    %c0_36 = arith.constant 0 : index
    %89 = vector.load %arg5[%c0_35, %c0_36] : memref<32x128xbf16, #tpu.memory_space<vmem>>, vector<32x128xbf16>
    %cst_37 = arith.constant dense<0.000000e+00> : vector<8x128xf32>
    %90 = tpu.matmul %88, %89, %cst_37 {dimension_numbers = #tpu.dot_dimension_numbers<[1], [0], [0], [1], [0, 0, 1, 1], [], []>} : vector<8x32xbf16>, vector<32x128xbf16>, vector<8x128xf32> -> vector<8x128xf32>
    %91 = arith.addf %87, %90 : vector<8x128xf32>
    %92 = vector.broadcast %3 : vector<1x128xf32> to vector<8x128xf32>
    %93 = arith.addf %91, %92 : vector<8x128xf32>
    %94 = vector.extract_strided_slice %93 {offsets = [0, 0], sizes = [8, 96], strides = [1, 1]} : vector<8x128xf32> to vector<8x96xf32>
    %95 = arith.negf %94 : vector<8x96xf32>
    %96 = math.exp %95 : vector<8x96xf32>
    %cst_38 = arith.constant 1.000000e+00 : f32
    %97 = vector.broadcast %cst_38 : f32 to vector<8x96xf32>
    %98 = arith.addf %97, %96 : vector<8x96xf32>
    %99 = arith.divf %97, %98 : vector<8x96xf32>
    %100 = vector.extract_strided_slice %99 {offsets = [0, 0], sizes = [8, 32], strides = [1, 1]} : vector<8x96xf32> to vector<8x32xf32>
    %101 = vector.extract_strided_slice %99 {offsets = [0, 32], sizes = [8, 32], strides = [1, 1]} : vector<8x96xf32> to vector<8x32xf32>
    %102 = vector.extract_strided_slice %99 {offsets = [0, 64], sizes = [8, 32], strides = [1, 1]} : vector<8x96xf32> to vector<8x32xf32>
    %103 = vector.extract_strided_slice %93 {offsets = [0, 96], sizes = [8, 32], strides = [1, 1]} : vector<8x128xf32> to vector<8x32xf32>
    %104 = math.tanh %103 : vector<8x32xf32>
    %105 = arith.mulf %101, %58 : vector<8x32xf32>
    %106 = arith.mulf %100, %104 : vector<8x32xf32>
    %107 = arith.addf %105, %106 : vector<8x32xf32>
    %108 = math.tanh %107 : vector<8x32xf32>
    %109 = arith.mulf %102, %108 : vector<8x32xf32>
    %c2_i32 = arith.constant 2 : i32
    %110 = arith.index_cast %c2_i32 : i32 to index
    %c0_39 = arith.constant 0 : index
    %c0_40 = arith.constant 0 : index
    %111 = vector.load %arg2[%110, %c0_39, %c0_40] : memref<8x8x128xbf16, #tpu.memory_space<vmem>>, vector<1x8x128xbf16>
    %112 = vector.shape_cast %111 : vector<1x8x128xbf16> to vector<8x128xbf16>
    %113 = arith.extf %112 : vector<8x128xbf16> to vector<8x128xf32>
    %114 = arith.truncf %84 : vector<8x32xf32> to vector<8x32xbf16>
    %c0_41 = arith.constant 0 : index
    %c0_42 = arith.constant 0 : index
    %115 = vector.load %arg3[%c0_41, %c0_42] : memref<32x128xbf16, #tpu.memory_space<vmem>>, vector<32x128xbf16>
    %cst_43 = arith.constant dense<0.000000e+00> : vector<8x128xf32>
    %116 = tpu.matmul %114, %115, %cst_43 {dimension_numbers = #tpu.dot_dimension_numbers<[1], [0], [0], [1], [0, 0, 1, 1], [], []>} : vector<8x32xbf16>, vector<32x128xbf16>, vector<8x128xf32> -> vector<8x128xf32>
    %117 = arith.addf %113, %116 : vector<8x128xf32>
    %118 = vector.extract_strided_slice %117 {offsets = [0, 0], sizes = [8, 96], strides = [1, 1]} : vector<8x128xf32> to vector<8x96xf32>
    %119 = arith.negf %118 : vector<8x96xf32>
    %120 = math.exp %119 : vector<8x96xf32>
    %cst_44 = arith.constant 1.000000e+00 : f32
    %121 = vector.broadcast %cst_44 : f32 to vector<8x96xf32>
    %122 = arith.addf %121, %120 : vector<8x96xf32>
    %123 = arith.divf %121, %122 : vector<8x96xf32>
    %124 = vector.extract_strided_slice %123 {offsets = [0, 0], sizes = [8, 32], strides = [1, 1]} : vector<8x96xf32> to vector<8x32xf32>
    %125 = vector.extract_strided_slice %123 {offsets = [0, 32], sizes = [8, 32], strides = [1, 1]} : vector<8x96xf32> to vector<8x32xf32>
    %126 = vector.extract_strided_slice %123 {offsets = [0, 64], sizes = [8, 32], strides = [1, 1]} : vector<8x96xf32> to vector<8x32xf32>
    %127 = vector.extract_strided_slice %117 {offsets = [0, 96], sizes = [8, 32], strides = [1, 1]} : vector<8x128xf32> to vector<8x32xf32>
    %128 = math.tanh %127 : vector<8x32xf32>
    %129 = arith.mulf %125, %82 : vector<8x32xf32>
    %130 = arith.mulf %124, %128 : vector<8x32xf32>
    %131 = arith.addf %129, %130 : vector<8x32xf32>
    %132 = math.tanh %131 : vector<8x32xf32>
    %133 = arith.mulf %126, %132 : vector<8x32xf32>
    %134 = arith.truncf %133 : vector<8x32xf32> to vector<8x32xbf16>
    %c0_45 = arith.constant 0 : index
    %c0_46 = arith.constant 0 : index
    %135 = vector.load %arg4[%c0_45, %c0_46] : memref<32x128xbf16, #tpu.memory_space<vmem>>, vector<32x128xbf16>
    %cst_47 = arith.constant dense<0.000000e+00> : vector<8x128xf32>
    %136 = tpu.matmul %134, %135, %cst_47 {dimension_numbers = #tpu.dot_dimension_numbers<[1], [0], [0], [1], [0, 0, 1, 1], [], []>} : vector<8x32xbf16>, vector<32x128xbf16>, vector<8x128xf32> -> vector<8x128xf32>
    %137 = arith.truncf %109 : vector<8x32xf32> to vector<8x32xbf16>
    %c0_48 = arith.constant 0 : index
    %c0_49 = arith.constant 0 : index
    %138 = vector.load %arg5[%c0_48, %c0_49] : memref<32x128xbf16, #tpu.memory_space<vmem>>, vector<32x128xbf16>
    %cst_50 = arith.constant dense<0.000000e+00> : vector<8x128xf32>
    %139 = tpu.matmul %137, %138, %cst_50 {dimension_numbers = #tpu.dot_dimension_numbers<[1], [0], [0], [1], [0, 0, 1, 1], [], []>} : vector<8x32xbf16>, vector<32x128xbf16>, vector<8x128xf32> -> vector<8x128xf32>
    %140 = arith.addf %136, %139 : vector<8x128xf32>
    %141 = vector.broadcast %3 : vector<1x128xf32> to vector<8x128xf32>
    %142 = arith.addf %140, %141 : vector<8x128xf32>
    %143 = vector.extract_strided_slice %142 {offsets = [0, 0], sizes = [8, 96], strides = [1, 1]} : vector<8x128xf32> to vector<8x96xf32>
    %144 = arith.negf %143 : vector<8x96xf32>
    %145 = math.exp %144 : vector<8x96xf32>
    %cst_51 = arith.constant 1.000000e+00 : f32
    %146 = vector.broadcast %cst_51 : f32 to vector<8x96xf32>
    %147 = arith.addf %146, %145 : vector<8x96xf32>
    %148 = arith.divf %146, %147 : vector<8x96xf32>
    %149 = vector.extract_strided_slice %148 {offsets = [0, 0], sizes = [8, 32], strides = [1, 1]} : vector<8x96xf32> to vector<8x32xf32>
    %150 = vector.extract_strided_slice %148 {offsets = [0, 32], sizes = [8, 32], strides = [1, 1]} : vector<8x96xf32> to vector<8x32xf32>
    %151 = vector.extract_strided_slice %148 {offsets = [0, 64], sizes = [8, 32], strides = [1, 1]} : vector<8x96xf32> to vector<8x32xf32>
    %152 = vector.extract_strided_slice %142 {offsets = [0, 96], sizes = [8, 32], strides = [1, 1]} : vector<8x128xf32> to vector<8x32xf32>
    %153 = math.tanh %152 : vector<8x32xf32>
    %154 = arith.mulf %150, %107 : vector<8x32xf32>
    %155 = arith.mulf %149, %153 : vector<8x32xf32>
    %156 = arith.addf %154, %155 : vector<8x32xf32>
    %157 = math.tanh %156 : vector<8x32xf32>
    %158 = arith.mulf %151, %157 : vector<8x32xf32>
    %c3_i32 = arith.constant 3 : i32
    %159 = arith.index_cast %c3_i32 : i32 to index
    %c0_52 = arith.constant 0 : index
    %c0_53 = arith.constant 0 : index
    %160 = vector.load %arg2[%159, %c0_52, %c0_53] : memref<8x8x128xbf16, #tpu.memory_space<vmem>>, vector<1x8x128xbf16>
    %161 = vector.shape_cast %160 : vector<1x8x128xbf16> to vector<8x128xbf16>
    %162 = arith.extf %161 : vector<8x128xbf16> to vector<8x128xf32>
    %163 = arith.truncf %133 : vector<8x32xf32> to vector<8x32xbf16>
    %c0_54 = arith.constant 0 : index
    %c0_55 = arith.constant 0 : index
    %164 = vector.load %arg3[%c0_54, %c0_55] : memref<32x128xbf16, #tpu.memory_space<vmem>>, vector<32x128xbf16>
    %cst_56 = arith.constant dense<0.000000e+00> : vector<8x128xf32>
    %165 = tpu.matmul %163, %164, %cst_56 {dimension_numbers = #tpu.dot_dimension_numbers<[1], [0], [0], [1], [0, 0, 1, 1], [], []>} : vector<8x32xbf16>, vector<32x128xbf16>, vector<8x128xf32> -> vector<8x128xf32>
    %166 = arith.addf %162, %165 : vector<8x128xf32>
    %167 = vector.extract_strided_slice %166 {offsets = [0, 0], sizes = [8, 96], strides = [1, 1]} : vector<8x128xf32> to vector<8x96xf32>
    %168 = arith.negf %167 : vector<8x96xf32>
    %169 = math.exp %168 : vector<8x96xf32>
    %cst_57 = arith.constant 1.000000e+00 : f32
    %170 = vector.broadcast %cst_57 : f32 to vector<8x96xf32>
    %171 = arith.addf %170, %169 : vector<8x96xf32>
    %172 = arith.divf %170, %171 : vector<8x96xf32>
    %173 = vector.extract_strided_slice %172 {offsets = [0, 0], sizes = [8, 32], strides = [1, 1]} : vector<8x96xf32> to vector<8x32xf32>
    %174 = vector.extract_strided_slice %172 {offsets = [0, 32], sizes = [8, 32], strides = [1, 1]} : vector<8x96xf32> to vector<8x32xf32>
    %175 = vector.extract_strided_slice %172 {offsets = [0, 64], sizes = [8, 32], strides = [1, 1]} : vector<8x96xf32> to vector<8x32xf32>
    %176 = vector.extract_strided_slice %166 {offsets = [0, 96], sizes = [8, 32], strides = [1, 1]} : vector<8x128xf32> to vector<8x32xf32>
    %177 = math.tanh %176 : vector<8x32xf32>
    %178 = arith.mulf %174, %131 : vector<8x32xf32>
    %179 = arith.mulf %173, %177 : vector<8x32xf32>
    %180 = arith.addf %178, %179 : vector<8x32xf32>
    %181 = math.tanh %180 : vector<8x32xf32>
    %182 = arith.mulf %175, %181 : vector<8x32xf32>
    %183 = arith.truncf %182 : vector<8x32xf32> to vector<8x32xbf16>
    %c0_58 = arith.constant 0 : index
    %c0_59 = arith.constant 0 : index
    %184 = vector.load %arg4[%c0_58, %c0_59] : memref<32x128xbf16, #tpu.memory_space<vmem>>, vector<32x128xbf16>
    %cst_60 = arith.constant dense<0.000000e+00> : vector<8x128xf32>
    %185 = tpu.matmul %183, %184, %cst_60 {dimension_numbers = #tpu.dot_dimension_numbers<[1], [0], [0], [1], [0, 0, 1, 1], [], []>} : vector<8x32xbf16>, vector<32x128xbf16>, vector<8x128xf32> -> vector<8x128xf32>
    %186 = arith.truncf %158 : vector<8x32xf32> to vector<8x32xbf16>
    %c0_61 = arith.constant 0 : index
    %c0_62 = arith.constant 0 : index
    %187 = vector.load %arg5[%c0_61, %c0_62] : memref<32x128xbf16, #tpu.memory_space<vmem>>, vector<32x128xbf16>
    %cst_63 = arith.constant dense<0.000000e+00> : vector<8x128xf32>
    %188 = tpu.matmul %186, %187, %cst_63 {dimension_numbers = #tpu.dot_dimension_numbers<[1], [0], [0], [1], [0, 0, 1, 1], [], []>} : vector<8x32xbf16>, vector<32x128xbf16>, vector<8x128xf32> -> vector<8x128xf32>
    %189 = arith.addf %185, %188 : vector<8x128xf32>
    %190 = vector.broadcast %3 : vector<1x128xf32> to vector<8x128xf32>
    %191 = arith.addf %189, %190 : vector<8x128xf32>
    %192 = vector.extract_strided_slice %191 {offsets = [0, 0], sizes = [8, 96], strides = [1, 1]} : vector<8x128xf32> to vector<8x96xf32>
    %193 = arith.negf %192 : vector<8x96xf32>
    %194 = math.exp %193 : vector<8x96xf32>
    %cst_64 = arith.constant 1.000000e+00 : f32
    %195 = vector.broadcast %cst_64 : f32 to vector<8x96xf32>
    %196 = arith.addf %195, %194 : vector<8x96xf32>
    %197 = arith.divf %195, %196 : vector<8x96xf32>
    %198 = vector.extract_strided_slice %197 {offsets = [0, 0], sizes = [8, 32], strides = [1, 1]} : vector<8x96xf32> to vector<8x32xf32>
    %199 = vector.extract_strided_slice %197 {offsets = [0, 32], sizes = [8, 32], strides = [1, 1]} : vector<8x96xf32> to vector<8x32xf32>
    %200 = vector.extract_strided_slice %197 {offsets = [0, 64], sizes = [8, 32], strides = [1, 1]} : vector<8x96xf32> to vector<8x32xf32>
    %201 = vector.extract_strided_slice %191 {offsets = [0, 96], sizes = [8, 32], strides = [1, 1]} : vector<8x128xf32> to vector<8x32xf32>
    %202 = math.tanh %201 : vector<8x32xf32>
    %203 = arith.mulf %199, %156 : vector<8x32xf32>
    %204 = arith.mulf %198, %202 : vector<8x32xf32>
    %205 = arith.addf %203, %204 : vector<8x32xf32>
    %206 = math.tanh %205 : vector<8x32xf32>
    %207 = arith.mulf %200, %206 : vector<8x32xf32>
    %c4_i32 = arith.constant 4 : i32
    %208 = arith.index_cast %c4_i32 : i32 to index
    %c0_65 = arith.constant 0 : index
    %c0_66 = arith.constant 0 : index
    %209 = vector.load %arg2[%208, %c0_65, %c0_66] : memref<8x8x128xbf16, #tpu.memory_space<vmem>>, vector<1x8x128xbf16>
    %210 = vector.shape_cast %209 : vector<1x8x128xbf16> to vector<8x128xbf16>
    %211 = arith.extf %210 : vector<8x128xbf16> to vector<8x128xf32>
    %212 = arith.truncf %182 : vector<8x32xf32> to vector<8x32xbf16>
    %c0_67 = arith.constant 0 : index
    %c0_68 = arith.constant 0 : index
    %213 = vector.load %arg3[%c0_67, %c0_68] : memref<32x128xbf16, #tpu.memory_space<vmem>>, vector<32x128xbf16>
    %cst_69 = arith.constant dense<0.000000e+00> : vector<8x128xf32>
    %214 = tpu.matmul %212, %213, %cst_69 {dimension_numbers = #tpu.dot_dimension_numbers<[1], [0], [0], [1], [0, 0, 1, 1], [], []>} : vector<8x32xbf16>, vector<32x128xbf16>, vector<8x128xf32> -> vector<8x128xf32>
    %215 = arith.addf %211, %214 : vector<8x128xf32>
    %216 = vector.extract_strided_slice %215 {offsets = [0, 0], sizes = [8, 96], strides = [1, 1]} : vector<8x128xf32> to vector<8x96xf32>
    %217 = arith.negf %216 : vector<8x96xf32>
    %218 = math.exp %217 : vector<8x96xf32>
    %cst_70 = arith.constant 1.000000e+00 : f32
    %219 = vector.broadcast %cst_70 : f32 to vector<8x96xf32>
    %220 = arith.addf %219, %218 : vector<8x96xf32>
    %221 = arith.divf %219, %220 : vector<8x96xf32>
    %222 = vector.extract_strided_slice %221 {offsets = [0, 0], sizes = [8, 32], strides = [1, 1]} : vector<8x96xf32> to vector<8x32xf32>
    %223 = vector.extract_strided_slice %221 {offsets = [0, 32], sizes = [8, 32], strides = [1, 1]} : vector<8x96xf32> to vector<8x32xf32>
    %224 = vector.extract_strided_slice %221 {offsets = [0, 64], sizes = [8, 32], strides = [1, 1]} : vector<8x96xf32> to vector<8x32xf32>
    %225 = vector.extract_strided_slice %215 {offsets = [0, 96], sizes = [8, 32], strides = [1, 1]} : vector<8x128xf32> to vector<8x32xf32>
    %226 = math.tanh %225 : vector<8x32xf32>
    %227 = arith.mulf %223, %180 : vector<8x32xf32>
    %228 = arith.mulf %222, %226 : vector<8x32xf32>
    %229 = arith.addf %227, %228 : vector<8x32xf32>
    %230 = math.tanh %229 : vector<8x32xf32>
    %231 = arith.mulf %224, %230 : vector<8x32xf32>
    %232 = arith.truncf %231 : vector<8x32xf32> to vector<8x32xbf16>
    %c0_71 = arith.constant 0 : index
    %c0_72 = arith.constant 0 : index
    %233 = vector.load %arg4[%c0_71, %c0_72] : memref<32x128xbf16, #tpu.memory_space<vmem>>, vector<32x128xbf16>
    %cst_73 = arith.constant dense<0.000000e+00> : vector<8x128xf32>
    %234 = tpu.matmul %232, %233, %cst_73 {dimension_numbers = #tpu.dot_dimension_numbers<[1], [0], [0], [1], [0, 0, 1, 1], [], []>} : vector<8x32xbf16>, vector<32x128xbf16>, vector<8x128xf32> -> vector<8x128xf32>
    %235 = arith.truncf %207 : vector<8x32xf32> to vector<8x32xbf16>
    %c0_74 = arith.constant 0 : index
    %c0_75 = arith.constant 0 : index
    %236 = vector.load %arg5[%c0_74, %c0_75] : memref<32x128xbf16, #tpu.memory_space<vmem>>, vector<32x128xbf16>
    %cst_76 = arith.constant dense<0.000000e+00> : vector<8x128xf32>
    %237 = tpu.matmul %235, %236, %cst_76 {dimension_numbers = #tpu.dot_dimension_numbers<[1], [0], [0], [1], [0, 0, 1, 1], [], []>} : vector<8x32xbf16>, vector<32x128xbf16>, vector<8x128xf32> -> vector<8x128xf32>
    %238 = arith.addf %234, %237 : vector<8x128xf32>
    %239 = vector.broadcast %3 : vector<1x128xf32> to vector<8x128xf32>
    %240 = arith.addf %238, %239 : vector<8x128xf32>
    %241 = vector.extract_strided_slice %240 {offsets = [0, 0], sizes = [8, 96], strides = [1, 1]} : vector<8x128xf32> to vector<8x96xf32>
    %242 = arith.negf %241 : vector<8x96xf32>
    %243 = math.exp %242 : vector<8x96xf32>
    %cst_77 = arith.constant 1.000000e+00 : f32
    %244 = vector.broadcast %cst_77 : f32 to vector<8x96xf32>
    %245 = arith.addf %244, %243 : vector<8x96xf32>
    %246 = arith.divf %244, %245 : vector<8x96xf32>
    %247 = vector.extract_strided_slice %246 {offsets = [0, 0], sizes = [8, 32], strides = [1, 1]} : vector<8x96xf32> to vector<8x32xf32>
    %248 = vector.extract_strided_slice %246 {offsets = [0, 32], sizes = [8, 32], strides = [1, 1]} : vector<8x96xf32> to vector<8x32xf32>
    %249 = vector.extract_strided_slice %246 {offsets = [0, 64], sizes = [8, 32], strides = [1, 1]} : vector<8x96xf32> to vector<8x32xf32>
    %250 = vector.extract_strided_slice %240 {offsets = [0, 96], sizes = [8, 32], strides = [1, 1]} : vector<8x128xf32> to vector<8x32xf32>
    %251 = math.tanh %250 : vector<8x32xf32>
    %252 = arith.mulf %248, %205 : vector<8x32xf32>
    %253 = arith.mulf %247, %251 : vector<8x32xf32>
    %254 = arith.addf %252, %253 : vector<8x32xf32>
    %255 = math.tanh %254 : vector<8x32xf32>
    %256 = arith.mulf %249, %255 : vector<8x32xf32>
    %c5_i32 = arith.constant 5 : i32
    %257 = arith.index_cast %c5_i32 : i32 to index
    %c0_78 = arith.constant 0 : index
    %c0_79 = arith.constant 0 : index
    %258 = vector.load %arg2[%257, %c0_78, %c0_79] : memref<8x8x128xbf16, #tpu.memory_space<vmem>>, vector<1x8x128xbf16>
    %259 = vector.shape_cast %258 : vector<1x8x128xbf16> to vector<8x128xbf16>
    %260 = arith.extf %259 : vector<8x128xbf16> to vector<8x128xf32>
    %261 = arith.truncf %231 : vector<8x32xf32> to vector<8x32xbf16>
    %c0_80 = arith.constant 0 : index
    %c0_81 = arith.constant 0 : index
    %262 = vector.load %arg3[%c0_80, %c0_81] : memref<32x128xbf16, #tpu.memory_space<vmem>>, vector<32x128xbf16>
    %cst_82 = arith.constant dense<0.000000e+00> : vector<8x128xf32>
    %263 = tpu.matmul %261, %262, %cst_82 {dimension_numbers = #tpu.dot_dimension_numbers<[1], [0], [0], [1], [0, 0, 1, 1], [], []>} : vector<8x32xbf16>, vector<32x128xbf16>, vector<8x128xf32> -> vector<8x128xf32>
    %264 = arith.addf %260, %263 : vector<8x128xf32>
    %265 = vector.extract_strided_slice %264 {offsets = [0, 0], sizes = [8, 96], strides = [1, 1]} : vector<8x128xf32> to vector<8x96xf32>
    %266 = arith.negf %265 : vector<8x96xf32>
    %267 = math.exp %266 : vector<8x96xf32>
    %cst_83 = arith.constant 1.000000e+00 : f32
    %268 = vector.broadcast %cst_83 : f32 to vector<8x96xf32>
    %269 = arith.addf %268, %267 : vector<8x96xf32>
    %270 = arith.divf %268, %269 : vector<8x96xf32>
    %271 = vector.extract_strided_slice %270 {offsets = [0, 0], sizes = [8, 32], strides = [1, 1]} : vector<8x96xf32> to vector<8x32xf32>
    %272 = vector.extract_strided_slice %270 {offsets = [0, 32], sizes = [8, 32], strides = [1, 1]} : vector<8x96xf32> to vector<8x32xf32>
    %273 = vector.extract_strided_slice %270 {offsets = [0, 64], sizes = [8, 32], strides = [1, 1]} : vector<8x96xf32> to vector<8x32xf32>
    %274 = vector.extract_strided_slice %264 {offsets = [0, 96], sizes = [8, 32], strides = [1, 1]} : vector<8x128xf32> to vector<8x32xf32>
    %275 = math.tanh %274 : vector<8x32xf32>
    %276 = arith.mulf %272, %229 : vector<8x32xf32>
    %277 = arith.mulf %271, %275 : vector<8x32xf32>
    %278 = arith.addf %276, %277 : vector<8x32xf32>
    %279 = math.tanh %278 : vector<8x32xf32>
    %280 = arith.mulf %273, %279 : vector<8x32xf32>
    %281 = arith.truncf %280 : vector<8x32xf32> to vector<8x32xbf16>
    %c0_84 = arith.constant 0 : index
    %c0_85 = arith.constant 0 : index
    %282 = vector.load %arg4[%c0_84, %c0_85] : memref<32x128xbf16, #tpu.memory_space<vmem>>, vector<32x128xbf16>
    %cst_86 = arith.constant dense<0.000000e+00> : vector<8x128xf32>
    %283 = tpu.matmul %281, %282, %cst_86 {dimension_numbers = #tpu.dot_dimension_numbers<[1], [0], [0], [1], [0, 0, 1, 1], [], []>} : vector<8x32xbf16>, vector<32x128xbf16>, vector<8x128xf32> -> vector<8x128xf32>
    %284 = arith.truncf %256 : vector<8x32xf32> to vector<8x32xbf16>
    %c0_87 = arith.constant 0 : index
    %c0_88 = arith.constant 0 : index
    %285 = vector.load %arg5[%c0_87, %c0_88] : memref<32x128xbf16, #tpu.memory_space<vmem>>, vector<32x128xbf16>
    %cst_89 = arith.constant dense<0.000000e+00> : vector<8x128xf32>
    %286 = tpu.matmul %284, %285, %cst_89 {dimension_numbers = #tpu.dot_dimension_numbers<[1], [0], [0], [1], [0, 0, 1, 1], [], []>} : vector<8x32xbf16>, vector<32x128xbf16>, vector<8x128xf32> -> vector<8x128xf32>
    %287 = arith.addf %283, %286 : vector<8x128xf32>
    %288 = vector.broadcast %3 : vector<1x128xf32> to vector<8x128xf32>
    %289 = arith.addf %287, %288 : vector<8x128xf32>
    %290 = vector.extract_strided_slice %289 {offsets = [0, 0], sizes = [8, 96], strides = [1, 1]} : vector<8x128xf32> to vector<8x96xf32>
    %291 = arith.negf %290 : vector<8x96xf32>
    %292 = math.exp %291 : vector<8x96xf32>
    %cst_90 = arith.constant 1.000000e+00 : f32
    %293 = vector.broadcast %cst_90 : f32 to vector<8x96xf32>
    %294 = arith.addf %293, %292 : vector<8x96xf32>
    %295 = arith.divf %293, %294 : vector<8x96xf32>
    %296 = vector.extract_strided_slice %295 {offsets = [0, 0], sizes = [8, 32], strides = [1, 1]} : vector<8x96xf32> to vector<8x32xf32>
    %297 = vector.extract_strided_slice %295 {offsets = [0, 32], sizes = [8, 32], strides = [1, 1]} : vector<8x96xf32> to vector<8x32xf32>
    %298 = vector.extract_strided_slice %295 {offsets = [0, 64], sizes = [8, 32], strides = [1, 1]} : vector<8x96xf32> to vector<8x32xf32>
    %299 = vector.extract_strided_slice %289 {offsets = [0, 96], sizes = [8, 32], strides = [1, 1]} : vector<8x128xf32> to vector<8x32xf32>
    %300 = math.tanh %299 : vector<8x32xf32>
    %301 = arith.mulf %297, %254 : vector<8x32xf32>
    %302 = arith.mulf %296, %300 : vector<8x32xf32>
    %303 = arith.addf %301, %302 : vector<8x32xf32>
    %304 = math.tanh %303 : vector<8x32xf32>
    %305 = arith.mulf %298, %304 : vector<8x32xf32>
    %c6_i32 = arith.constant 6 : i32
    %306 = arith.index_cast %c6_i32 : i32 to index
    %c0_91 = arith.constant 0 : index
    %c0_92 = arith.constant 0 : index
    %307 = vector.load %arg2[%306, %c0_91, %c0_92] : memref<8x8x128xbf16, #tpu.memory_space<vmem>>, vector<1x8x128xbf16>
    %308 = vector.shape_cast %307 : vector<1x8x128xbf16> to vector<8x128xbf16>
    %309 = arith.extf %308 : vector<8x128xbf16> to vector<8x128xf32>
    %310 = arith.truncf %280 : vector<8x32xf32> to vector<8x32xbf16>
    %c0_93 = arith.constant 0 : index
    %c0_94 = arith.constant 0 : index
    %311 = vector.load %arg3[%c0_93, %c0_94] : memref<32x128xbf16, #tpu.memory_space<vmem>>, vector<32x128xbf16>
    %cst_95 = arith.constant dense<0.000000e+00> : vector<8x128xf32>
    %312 = tpu.matmul %310, %311, %cst_95 {dimension_numbers = #tpu.dot_dimension_numbers<[1], [0], [0], [1], [0, 0, 1, 1], [], []>} : vector<8x32xbf16>, vector<32x128xbf16>, vector<8x128xf32> -> vector<8x128xf32>
    %313 = arith.addf %309, %312 : vector<8x128xf32>
    %314 = vector.extract_strided_slice %313 {offsets = [0, 0], sizes = [8, 96], strides = [1, 1]} : vector<8x128xf32> to vector<8x96xf32>
    %315 = arith.negf %314 : vector<8x96xf32>
    %316 = math.exp %315 : vector<8x96xf32>
    %cst_96 = arith.constant 1.000000e+00 : f32
    %317 = vector.broadcast %cst_96 : f32 to vector<8x96xf32>
    %318 = arith.addf %317, %316 : vector<8x96xf32>
    %319 = arith.divf %317, %318 : vector<8x96xf32>
    %320 = vector.extract_strided_slice %319 {offsets = [0, 0], sizes = [8, 32], strides = [1, 1]} : vector<8x96xf32> to vector<8x32xf32>
    %321 = vector.extract_strided_slice %319 {offsets = [0, 32], sizes = [8, 32], strides = [1, 1]} : vector<8x96xf32> to vector<8x32xf32>
    %322 = vector.extract_strided_slice %319 {offsets = [0, 64], sizes = [8, 32], strides = [1, 1]} : vector<8x96xf32> to vector<8x32xf32>
    %323 = vector.extract_strided_slice %313 {offsets = [0, 96], sizes = [8, 32], strides = [1, 1]} : vector<8x128xf32> to vector<8x32xf32>
    %324 = math.tanh %323 : vector<8x32xf32>
    %325 = arith.mulf %321, %278 : vector<8x32xf32>
    %326 = arith.mulf %320, %324 : vector<8x32xf32>
    %327 = arith.addf %325, %326 : vector<8x32xf32>
    %328 = math.tanh %327 : vector<8x32xf32>
    %329 = arith.mulf %322, %328 : vector<8x32xf32>
    %330 = arith.truncf %329 : vector<8x32xf32> to vector<8x32xbf16>
    %c0_97 = arith.constant 0 : index
    %c0_98 = arith.constant 0 : index
    %331 = vector.load %arg4[%c0_97, %c0_98] : memref<32x128xbf16, #tpu.memory_space<vmem>>, vector<32x128xbf16>
    %cst_99 = arith.constant dense<0.000000e+00> : vector<8x128xf32>
    %332 = tpu.matmul %330, %331, %cst_99 {dimension_numbers = #tpu.dot_dimension_numbers<[1], [0], [0], [1], [0, 0, 1, 1], [], []>} : vector<8x32xbf16>, vector<32x128xbf16>, vector<8x128xf32> -> vector<8x128xf32>
    %333 = arith.truncf %305 : vector<8x32xf32> to vector<8x32xbf16>
    %c0_100 = arith.constant 0 : index
    %c0_101 = arith.constant 0 : index
    %334 = vector.load %arg5[%c0_100, %c0_101] : memref<32x128xbf16, #tpu.memory_space<vmem>>, vector<32x128xbf16>
    %cst_102 = arith.constant dense<0.000000e+00> : vector<8x128xf32>
    %335 = tpu.matmul %333, %334, %cst_102 {dimension_numbers = #tpu.dot_dimension_numbers<[1], [0], [0], [1], [0, 0, 1, 1], [], []>} : vector<8x32xbf16>, vector<32x128xbf16>, vector<8x128xf32> -> vector<8x128xf32>
    %336 = arith.addf %332, %335 : vector<8x128xf32>
    %337 = vector.broadcast %3 : vector<1x128xf32> to vector<8x128xf32>
    %338 = arith.addf %336, %337 : vector<8x128xf32>
    %339 = vector.extract_strided_slice %338 {offsets = [0, 0], sizes = [8, 96], strides = [1, 1]} : vector<8x128xf32> to vector<8x96xf32>
    %340 = arith.negf %339 : vector<8x96xf32>
    %341 = math.exp %340 : vector<8x96xf32>
    %cst_103 = arith.constant 1.000000e+00 : f32
    %342 = vector.broadcast %cst_103 : f32 to vector<8x96xf32>
    %343 = arith.addf %342, %341 : vector<8x96xf32>
    %344 = arith.divf %342, %343 : vector<8x96xf32>
    %345 = vector.extract_strided_slice %344 {offsets = [0, 0], sizes = [8, 32], strides = [1, 1]} : vector<8x96xf32> to vector<8x32xf32>
    %346 = vector.extract_strided_slice %344 {offsets = [0, 32], sizes = [8, 32], strides = [1, 1]} : vector<8x96xf32> to vector<8x32xf32>
    %347 = vector.extract_strided_slice %344 {offsets = [0, 64], sizes = [8, 32], strides = [1, 1]} : vector<8x96xf32> to vector<8x32xf32>
    %348 = vector.extract_strided_slice %338 {offsets = [0, 96], sizes = [8, 32], strides = [1, 1]} : vector<8x128xf32> to vector<8x32xf32>
    %349 = math.tanh %348 : vector<8x32xf32>
    %350 = arith.mulf %346, %303 : vector<8x32xf32>
    %351 = arith.mulf %345, %349 : vector<8x32xf32>
    %352 = arith.addf %350, %351 : vector<8x32xf32>
    %353 = math.tanh %352 : vector<8x32xf32>
    %354 = arith.mulf %347, %353 : vector<8x32xf32>
    %c7_i32 = arith.constant 7 : i32
    %355 = arith.index_cast %c7_i32 : i32 to index
    %c0_104 = arith.constant 0 : index
    %c0_105 = arith.constant 0 : index
    %356 = vector.load %arg2[%355, %c0_104, %c0_105] : memref<8x8x128xbf16, #tpu.memory_space<vmem>>, vector<1x8x128xbf16>
    %357 = vector.shape_cast %356 : vector<1x8x128xbf16> to vector<8x128xbf16>
    %358 = arith.extf %357 : vector<8x128xbf16> to vector<8x128xf32>
    %359 = arith.truncf %329 : vector<8x32xf32> to vector<8x32xbf16>
    %c0_106 = arith.constant 0 : index
    %c0_107 = arith.constant 0 : index
    %360 = vector.load %arg3[%c0_106, %c0_107] : memref<32x128xbf16, #tpu.memory_space<vmem>>, vector<32x128xbf16>
    %cst_108 = arith.constant dense<0.000000e+00> : vector<8x128xf32>
    %361 = tpu.matmul %359, %360, %cst_108 {dimension_numbers = #tpu.dot_dimension_numbers<[1], [0], [0], [1], [0, 0, 1, 1], [], []>} : vector<8x32xbf16>, vector<32x128xbf16>, vector<8x128xf32> -> vector<8x128xf32>
    %362 = arith.addf %358, %361 : vector<8x128xf32>
    %363 = vector.extract_strided_slice %362 {offsets = [0, 0], sizes = [8, 96], strides = [1, 1]} : vector<8x128xf32> to vector<8x96xf32>
    %364 = arith.negf %363 : vector<8x96xf32>
    %365 = math.exp %364 : vector<8x96xf32>
    %cst_109 = arith.constant 1.000000e+00 : f32
    %366 = vector.broadcast %cst_109 : f32 to vector<8x96xf32>
    %367 = arith.addf %366, %365 : vector<8x96xf32>
    %368 = arith.divf %366, %367 : vector<8x96xf32>
    %369 = vector.extract_strided_slice %368 {offsets = [0, 0], sizes = [8, 32], strides = [1, 1]} : vector<8x96xf32> to vector<8x32xf32>
    %370 = vector.extract_strided_slice %368 {offsets = [0, 32], sizes = [8, 32], strides = [1, 1]} : vector<8x96xf32> to vector<8x32xf32>
    %371 = vector.extract_strided_slice %368 {offsets = [0, 64], sizes = [8, 32], strides = [1, 1]} : vector<8x96xf32> to vector<8x32xf32>
    %372 = vector.extract_strided_slice %362 {offsets = [0, 96], sizes = [8, 32], strides = [1, 1]} : vector<8x128xf32> to vector<8x32xf32>
    %373 = math.tanh %372 : vector<8x32xf32>
    %374 = arith.mulf %370, %327 : vector<8x32xf32>
    %375 = arith.mulf %369, %373 : vector<8x32xf32>
    %376 = arith.addf %374, %375 : vector<8x32xf32>
    %377 = math.tanh %376 : vector<8x32xf32>
    %378 = arith.mulf %371, %377 : vector<8x32xf32>
    %379 = arith.truncf %378 : vector<8x32xf32> to vector<8x32xbf16>
    %c0_110 = arith.constant 0 : index
    %c0_111 = arith.constant 0 : index
    %380 = vector.load %arg4[%c0_110, %c0_111] : memref<32x128xbf16, #tpu.memory_space<vmem>>, vector<32x128xbf16>
    %cst_112 = arith.constant dense<0.000000e+00> : vector<8x128xf32>
    %381 = tpu.matmul %379, %380, %cst_112 {dimension_numbers = #tpu.dot_dimension_numbers<[1], [0], [0], [1], [0, 0, 1, 1], [], []>} : vector<8x32xbf16>, vector<32x128xbf16>, vector<8x128xf32> -> vector<8x128xf32>
    %382 = arith.truncf %354 : vector<8x32xf32> to vector<8x32xbf16>
    %c0_113 = arith.constant 0 : index
    %c0_114 = arith.constant 0 : index
    %383 = vector.load %arg5[%c0_113, %c0_114] : memref<32x128xbf16, #tpu.memory_space<vmem>>, vector<32x128xbf16>
    %cst_115 = arith.constant dense<0.000000e+00> : vector<8x128xf32>
    %384 = tpu.matmul %382, %383, %cst_115 {dimension_numbers = #tpu.dot_dimension_numbers<[1], [0], [0], [1], [0, 0, 1, 1], [], []>} : vector<8x32xbf16>, vector<32x128xbf16>, vector<8x128xf32> -> vector<8x128xf32>
    %385 = arith.addf %381, %384 : vector<8x128xf32>
    %386 = vector.broadcast %3 : vector<1x128xf32> to vector<8x128xf32>
    %387 = arith.addf %385, %386 : vector<8x128xf32>
    %388 = vector.extract_strided_slice %387 {offsets = [0, 0], sizes = [8, 96], strides = [1, 1]} : vector<8x128xf32> to vector<8x96xf32>
    %389 = arith.negf %388 : vector<8x96xf32>
    %390 = math.exp %389 : vector<8x96xf32>
    %cst_116 = arith.constant 1.000000e+00 : f32
    %391 = vector.broadcast %cst_116 : f32 to vector<8x96xf32>
    %392 = arith.addf %391, %390 : vector<8x96xf32>
    %393 = arith.divf %391, %392 : vector<8x96xf32>
    %394 = vector.extract_strided_slice %393 {offsets = [0, 0], sizes = [8, 32], strides = [1, 1]} : vector<8x96xf32> to vector<8x32xf32>
    %395 = vector.extract_strided_slice %393 {offsets = [0, 32], sizes = [8, 32], strides = [1, 1]} : vector<8x96xf32> to vector<8x32xf32>
    %396 = vector.extract_strided_slice %393 {offsets = [0, 64], sizes = [8, 32], strides = [1, 1]} : vector<8x96xf32> to vector<8x32xf32>
    %397 = vector.extract_strided_slice %387 {offsets = [0, 96], sizes = [8, 32], strides = [1, 1]} : vector<8x128xf32> to vector<8x32xf32>
    %398 = math.tanh %397 : vector<8x32xf32>
    %399 = arith.mulf %395, %352 : vector<8x32xf32>
    %400 = arith.mulf %394, %398 : vector<8x32xf32>
    %401 = arith.addf %399, %400 : vector<8x32xf32>
    %402 = math.tanh %401 : vector<8x32xf32>
    %403 = arith.mulf %396, %402 : vector<8x32xf32>
    %c8_i32 = arith.constant 8 : i32
    %c0_117 = arith.constant 0 : index
    %c0_118 = arith.constant 0 : index
    %c0_119 = arith.constant 0 : index
    %404 = vector.load %arg14[%c0_117, %c0_118, %c0_119] : memref<2x8x32xf32, #tpu.memory_space<vmem>>, vector<1x8x32xf32>
    %405 = vector.shape_cast %404 : vector<1x8x32xf32> to vector<8x32xf32>
    %406 = vector.shape_cast %378 : vector<8x32xf32> to vector<1x8x32xf32>
    tpu.vector_store %arg14[%c0_117, %c0_118, %c0_119], %406 {strides = array<i32>} : memref<2x8x32xf32, #tpu.memory_space<vmem>>, vector<1x8x32xf32>,
    %c1_120 = arith.constant 1 : index
    %c0_121 = arith.constant 0 : index
    %c0_122 = arith.constant 0 : index
    %407 = vector.load %arg14[%c1_120, %c0_121, %c0_122] : memref<2x8x32xf32, #tpu.memory_space<vmem>>, vector<1x8x32xf32>
    %408 = vector.shape_cast %407 : vector<1x8x32xf32> to vector<8x32xf32>
    %409 = vector.shape_cast %403 : vector<8x32xf32> to vector<1x8x32xf32>
    tpu.vector_store %arg14[%c1_120, %c0_121, %c0_122], %409 {strides = array<i32>} : memref<2x8x32xf32, #tpu.memory_space<vmem>>, vector<1x8x32xf32>,
    %c0_123 = arith.constant 0 : index
    %c0_124 = arith.constant 0 : index
    %c0_125 = arith.constant 0 : index
    %410 = vector.load %arg15[%c0_123, %c0_124, %c0_125] : memref<2x8x32xf32, #tpu.memory_space<vmem>>, vector<1x8x32xf32>
    %411 = vector.shape_cast %410 : vector<1x8x32xf32> to vector<8x32xf32>
    %412 = vector.shape_cast %376 : vector<8x32xf32> to vector<1x8x32xf32>
    tpu.vector_store %arg15[%c0_123, %c0_124, %c0_125], %412 {strides = array<i32>} : memref<2x8x32xf32, #tpu.memory_space<vmem>>, vector<1x8x32xf32>,
    %c1_126 = arith.constant 1 : index
    %c0_127 = arith.constant 0 : index
    %c0_128 = arith.constant 0 : index
    %413 = vector.load %arg15[%c1_126, %c0_127, %c0_128] : memref<2x8x32xf32, #tpu.memory_space<vmem>>, vector<1x8x32xf32>
    %414 = vector.shape_cast %413 : vector<1x8x32xf32> to vector<8x32xf32>
    %415 = vector.shape_cast %401 : vector<8x32xf32> to vector<1x8x32xf32>
    tpu.vector_store %arg15[%c1_126, %c0_127, %c0_128], %415 {strides = array<i32>} : memref<2x8x32xf32, #tpu.memory_space<vmem>>, vector<1x8x32xf32>,
    %c0_i32_129 = arith.constant 0 : i32
    %416 = arith.cmpi eq, %arg1, %c0_i32_129 : i32
    %417 = arith.extui %416 : i1 to i32
    %c0_i32_130 = arith.constant 0 : i32
    %418 = arith.cmpi ne, %417, %c0_i32_130 : i32
    scf.if %418 {
      %c0_131 = arith.constant 0 : index
      %c0_132 = arith.constant 0 : index
      %419 = vector.load %arg7[%c0_131, %c0_132] : memref<1x32xf32, #tpu.memory_space<vmem>>, vector<1x32xf32>
      %420 = vector.broadcast %419 : vector<1x32xf32> to vector<8x32xf32>
      %421 = arith.mulf %403, %420 : vector<8x32xf32>
      %cst_133 = arith.constant dense<0.000000e+00> : vector<8xf32>
      %422 = vector.multi_reduction <add>, %421, %cst_133 [1] : vector<8x32xf32> to vector<8xf32>
      %423 = vector.shape_cast %422 : vector<8xf32> to vector<8x1xf32>
      %c0_134 = arith.constant 0 : index
      %c0_135 = arith.constant 0 : index
      %424 = vector.load %arg8[%c0_134, %c0_135] : memref<1x1xf32, #tpu.memory_space<vmem>>, vector<1x1xf32>
      %425 = vector.broadcast %424 : vector<1x1xf32> to vector<8x1xf32>
      %426 = arith.addf %423, %425 : vector<8x1xf32>
      %427 = arith.negf %426 : vector<8x1xf32>
      %428 = math.exp %427 : vector<8x1xf32>
      %cst_136 = arith.constant 1.000000e+00 : f32
      %429 = vector.broadcast %cst_136 : f32 to vector<8x1xf32>
      %430 = arith.addf %429, %428 : vector<8x1xf32>
      %431 = arith.divf %429, %430 : vector<8x1xf32>
      %c0_137 = arith.constant 0 : index
      %c0_138 = arith.constant 0 : index
      %432 = vector.load %arg11[%c0_137, %c0_138] : memref<8x1xf32, #tpu.memory_space<vmem>>, vector<8x1xf32>
      tpu.vector_store %arg11[%c0_137, %c0_138], %431 {strides = array<i32>} : memref<8x1xf32, #tpu.memory_space<vmem>>, vector<8x1xf32>,
      %c0_139 = arith.constant 0 : index
      %c0_140 = arith.constant 0 : index
      %c0_141 = arith.constant 0 : index
      %433 = vector.load %arg12[%c0_139, %c0_140, %c0_141] : memref<2x8x32xf32, #tpu.memory_space<vmem>>, vector<1x8x32xf32>
      %434 = vector.shape_cast %433 : vector<1x8x32xf32> to vector<8x32xf32>
      %435 = vector.shape_cast %378 : vector<8x32xf32> to vector<1x8x32xf32>
      tpu.vector_store %arg12[%c0_139, %c0_140, %c0_141], %435 {strides = array<i32>} : memref<2x8x32xf32, #tpu.memory_space<vmem>>, vector<1x8x32xf32>,
      %c1_142 = arith.constant 1 : index
      %c0_143 = arith.constant 0 : index
      %c0_144 = arith.constant 0 : index
      %436 = vector.load %arg12[%c1_142, %c0_143, %c0_144] : memref<2x8x32xf32, #tpu.memory_space<vmem>>, vector<1x8x32xf32>
      %437 = vector.shape_cast %436 : vector<1x8x32xf32> to vector<8x32xf32>
      %438 = vector.shape_cast %403 : vector<8x32xf32> to vector<1x8x32xf32>
      tpu.vector_store %arg12[%c1_142, %c0_143, %c0_144], %438 {strides = array<i32>} : memref<2x8x32xf32, #tpu.memory_space<vmem>>, vector<1x8x32xf32>,
      %c0_145 = arith.constant 0 : index
      %c0_146 = arith.constant 0 : index
      %c0_147 = arith.constant 0 : index
      %439 = vector.load %arg13[%c0_145, %c0_146, %c0_147] : memref<2x8x32xf32, #tpu.memory_space<vmem>>, vector<1x8x32xf32>
      %440 = vector.shape_cast %439 : vector<1x8x32xf32> to vector<8x32xf32>
      %441 = vector.shape_cast %376 : vector<8x32xf32> to vector<1x8x32xf32>
      tpu.vector_store %arg13[%c0_145, %c0_146, %c0_147], %441 {strides = array<i32>} : memref<2x8x32xf32, #tpu.memory_space<vmem>>, vector<1x8x32xf32>,
      %c1_148 = arith.constant 1 : index
      %c0_149 = arith.constant 0 : index
      %c0_150 = arith.constant 0 : index
      %442 = vector.load %arg13[%c1_148, %c0_149, %c0_150] : memref<2x8x32xf32, #tpu.memory_space<vmem>>, vector<1x8x32xf32>
      %443 = vector.shape_cast %442 : vector<1x8x32xf32> to vector<8x32xf32>
      %444 = vector.shape_cast %401 : vector<8x32xf32> to vector<1x8x32xf32>
      tpu.vector_store %arg13[%c1_148, %c0_149, %c0_150], %444 {strides = array<i32>} : memref<2x8x32xf32, #tpu.memory_space<vmem>>, vector<1x8x32xf32>,
    } else {
    }
    return
  }
  func.func @transform_0(%arg0: i32, %arg1: i32) -> (i32, i32, i32) {
    %c0_i32 = arith.constant 0 : i32
    %c0_i32_0 = arith.constant 0 : i32
    return %arg1, %arg0, %c0_i32 : i32, i32, i32
  }
  func.func @transform_1(%arg0: i32, %arg1: i32) -> (i32, i32) {
    %c0_i32 = arith.constant 0 : i32
    %c0_i32_0 = arith.constant 0 : i32
    %c0_i32_1 = arith.constant 0 : i32
    return %c0_i32, %c0_i32_0 : i32, i32
  }
  func.func @transform_2(%arg0: i32, %arg1: i32) -> (i32, i32) {
    %c0_i32 = arith.constant 0 : i32
    %c0_i32_0 = arith.constant 0 : i32
    %c0_i32_1 = arith.constant 0 : i32
    return %c0_i32, %c0_i32_0 : i32, i32
  }
  func.func @transform_3(%arg0: i32, %arg1: i32) -> (i32, i32) {
    %c0_i32 = arith.constant 0 : i32
    %c0_i32_0 = arith.constant 0 : i32
    %c0_i32_1 = arith.constant 0 : i32
    return %c0_i32, %c0_i32_0 : i32, i32
  }
  func.func @transform_4(%arg0: i32, %arg1: i32) -> (i32, i32) {
    %c0_i32 = arith.constant 0 : i32
    %c0_i32_0 = arith.constant 0 : i32
    %c0_i32_1 = arith.constant 0 : i32
    return %c0_i32, %c0_i32_0 : i32, i32
  }
  func.func @transform_5(%arg0: i32, %arg1: i32) -> (i32, i32) {
    %c0_i32 = arith.constant 0 : i32
    %c0_i32_0 = arith.constant 0 : i32
    %c0_i32_1 = arith.constant 0 : i32
    return %c0_i32, %c0_i32_0 : i32, i32
  }
  func.func @transform_6(%arg0: i32, %arg1: i32) -> (i32, i32) {
    %c0_i32 = arith.constant 0 : i32
    %c0_i32_0 = arith.constant 0 : i32
    %c0_i32_1 = arith.constant 0 : i32
    return %c0_i32, %c0_i32_0 : i32, i32
  }
  func.func @transform_7(%arg0: i32, %arg1: i32) -> (i32, i32, i32) {
    %c0_i32 = arith.constant 0 : i32
    %c0_i32_0 = arith.constant 0 : i32
    %c0_i32_1 = arith.constant 0 : i32
    return %c0_i32, %arg0, %c0_i32_0 : i32, i32, i32
  }
  func.func @transform_8(%arg0: i32, %arg1: i32) -> (i32, i32, i32) {
    %c0_i32 = arith.constant 0 : i32
    %c0_i32_0 = arith.constant 0 : i32
    %c0_i32_1 = arith.constant 0 : i32
    return %c0_i32, %arg0, %c0_i32_0 : i32, i32, i32
  }
  func.func @transform_9(%arg0: i32, %arg1: i32) -> (i32, i32) {
    %c0_i32 = arith.constant 0 : i32
    %c0_i32_0 = arith.constant 0 : i32
    return %arg0, %c0_i32 : i32, i32
  }
  func.func @transform_10(%arg0: i32, %arg1: i32) -> (i32, i32, i32) {
    %c0_i32 = arith.constant 0 : i32
    %c0_i32_0 = arith.constant 0 : i32
    %c0_i32_1 = arith.constant 0 : i32
    return %c0_i32, %arg0, %c0_i32_0 : i32, i32, i32
  }
  func.func @transform_11(%arg0: i32, %arg1: i32) -> (i32, i32, i32) {
    %c0_i32 = arith.constant 0 : i32
    %c0_i32_0 = arith.constant 0 : i32
    %c0_i32_1 = arith.constant 0 : i32
    return %c0_i32, %arg0, %c0_i32_0 : i32, i32, i32
  }
}

</mosaic_0001>

<bundles_post_ra>
// kernel: sentiment_rnn_forward.1
= control target key start
LH: loop header
LB: loop body
LE: loop exit
PB: predicated region body
PF: predicated region fallthrough
CT: control target
= control target key end

     0   :  { %v2164_v0 = vmov 0.0   ;;  %vm2165_vm0 = vmmov 0   ;;  %vm44_vm1 = vcmask 261120   ;;  %s2166_s27 = smov 32   ;;  %s2167_s18 = smov 64   ;;  %vm1671_vm2 = vcmask 7168   ;;  %s2648_s1 = inlined_call_operand.vmem [shape: bf16[32,128], index: 1, kind: input, shape index: {}]   ;;  %s2649_s7 = inlined_call_operand.vmem [shape: f32[2,8,32], index: 7, kind: input, shape index: {}]   ;;  %s2650_s8 = inlined_call_operand.vmem [shape: f32[2,8,32], index: 8, kind: input, shape index: {}]   ;;  %s2651_s0 = inlined_call_operand.vmem [shape: bf16[8,8,128], index: 0, kind: input, shape index: {}]   ;;  %s2652_s3 = inlined_call_operand.vmem [shape: bf16[32,128], index: 3, kind: input, shape index: {}]   ;;  %s2653_s2 = inlined_call_operand.vmem [shape: bf16[32,128], index: 2, kind: input, shape index: {}]   ;;  %s2654_s4 = inlined_call_operand.vmem [shape: f32[1,128], index: 4, kind: input, shape index: {}]   ;;  %s2655_s5 = inlined_call_operand.vmem [shape: f32[1,32], index: 5, kind: input, shape index: {}]   ;;  %s2656_s6 = inlined_call_operand.<no memory space> [shape: f32[1,1], index: 6, kind: input, shape index: {}]   ;;  %s2657_s10 = inlined_call_operand.vmem [shape: f32[2,8,32], index: 10, kind: output, shape index: {1}]   ;;  %s2658_s11 = inlined_call_operand.vmem [shape: f32[2,8,32], index: 11, kind: output, shape index: {2}]   ;;  %s2659_s9 = inlined_call_operand.vmem [shape: f32[8,1], index: 9, kind: output, shape index: {0}]  }
   0x1   :  { %1822 = vmatprep.subr.bf16.mxu0 %v2164_v0  ;;  %v2233_v1 = vld [vmem:[%s2648_s1 + $0x8] sm:$0xff]   ;;  %1826 = vmatprep.mubr.msk.bf16.mxu0 %vm2165_vm0, %v2164_v0  ;;  %v2244_v2 = vld [vmem:[%s2648_s1] sm:$0xff]  }
   0x2   :  { %1830 = vmatprep.subr.bf16.mxu1 %v2164_v0  ;;  %1834 = vmatprep.mubr.msk.bf16.mxu1 %vm2165_vm0, %v2164_v0  ;;  %v42_v3 = vld [vmem:[%s2649_s7] sm:$0xff]  ;;  %v43_v26 = vld [vmem:[%s2649_s7 + $0x8] sm:$0xff] }
   0x3   :  { %1823 = vmatpush3.bf16.msra.mxu0 %v2233_v1  ;;  %45 = vst.msk [vmem:[#allocation2] sm:$0xff] %vm44_vm1, %v42_v3  ;;  %v47_v6 = vld [vmem:[%s2650_s8] sm:$0xff]  ;;  %v2275_v27 = vld [vmem:[%s2652_s3 + $0x8] sm:$0xff]   ;;  %46 = vst.msk [vmem:[#allocation2 + $0x8] sm:$0xff] %vm44_vm1, %v43_v26 }
   0x4   :  { %1824 = vmatprep.subr.bf16.mxu0 %v2164_v0  ;;  %49 = vst.msk [vmem:[#allocation3] sm:$0xff] %vm44_vm1, %v47_v6  ;;  %v58_v7 = vld [vmem:[%s2651_s0] sm:$0xf]  ;;  %1831 = vmatpush3.bf16.msra.mxu1 %v2275_v27  ;;  %v2287_v29 = vld [vmem:[%s2653_s2 + $0x8] sm:$0xff]  }
   0x5   :  { %v59_v8 = vunpack.c.l.bf16 %v58_v7  ;;  %v2281_v28 = vld [vmem:[%s2652_s3] sm:$0xff]   ;;  %1832 = vmatprep.subr.bf16.mxu1 %v2164_v0  ;;  %v48_v42 = vld [vmem:[%s2650_s8 + $0x8] sm:$0xff] }
   0x6   :  { %v2294_v30 = vld [vmem:[%s2653_s2] sm:$0xff]   ;;  %50 = vst.msk [vmem:[#allocation3 + $0x8] sm:$0xff] %vm44_vm1, %v48_v42 }
   0x7   :  { %1825 = vmatpush3.bf16.msra.mxu0 %v2244_v2  ;;  %v2331_v43 = vld [vmem:[%s2651_s0 + $0x4] sm:$0xff]   ;;  %v2337_v45 = vld [vmem:[%s2654_s4] ss:$0 sm:$0xff] }
   0x8   :  { %1838 = vmatprep.subr.bf16.mxu0 %v2164_v0  ;;  %1833 = vmatpush3.bf16.msra.mxu1 %v2281_v28  ;;  %v310_v44 = vunpack.c.l.bf16 %v2331_v43 }
   0x9   :  { %1846 = vmatprep.subr.bf16.mxu1 %v2164_v0 }
   0xa   :  { %v52_v4 = vld [vmem:[#allocation2] sm:$0xff]  ;;  %v55_v32 = vld [vmem:[#allocation2 + $0x8] sm:$0xff] }
   0xb   :  { %v60_v5 = vpack.c.bf16 %v52_v4, %v52_v4  ;;  %v53_v15 = vld [vmem:[#allocation3] sm:$0xff]  ;;  %v155_v33 = vpack.c.bf16 %v55_v32, %v55_v32 }
   0xd   :  { %1827 = vmatmul.mubr.msk.bf16.vlgmr.msra.gmra.mxu0 %vm44_vm1, %v60_v5  ;;  %1835 = vmatmul.mubr.msk.bf16.vlgmr.msra.gmra.mxu1 %vm44_vm1, %v155_v33  ;;  %v57_v59 = vld [vmem:[#allocation3 + $0x8] sm:$0xff] }
   0xe   :  { %1842 = vmatprep.mubr.msk.bf16.mxu0 %vm2165_vm0, %v2164_v0  ;;  %1839 = vmatpush3.bf16.msra.mxu0 %v2287_v29 }
   0xf   :  { %1840 = vmatprep.subr.bf16.mxu0 %v2164_v0  ;;  %1847 = vmatpush3.bf16.msra.mxu1 %v2233_v1 }
  0x10   :  { %1850 = vmatprep.mubr.msk.bf16.mxu1 %vm2165_vm0, %v2164_v0  ;;  %1848 = vmatprep.subr.bf16.mxu1 %v2164_v0 }
  0x12   :  { %1841 = vmatpush3.bf16.msra.mxu0 %v2294_v30 }
  0x13   :  { %1854 = vmatprep.subr.bf16.mxu0 %v2164_v0  ;;  %1849 = vmatpush3.bf16.msra.mxu1 %v2244_v2 }
  0x14   :  { %1862 = vmatprep.subr.bf16.mxu1 %v2164_v0 }
  0xcd   :  { %v115_v9 = vpop.f32.mrf.mxu0  ;;  %v209_v37 = vpop.f32.mrf.mxu1 }
  0xce   :  { %v121_v10 = vadd.f32 %v115_v9, %v59_v8 }
  0xcf   :  { %v1828_v11 = vpop.f32.mrf.mxu0  ;;  %v1836_v38 = vpop.f32.mrf.mxu1 }
  0xd0   :  { %2025 = vtanh.f32 %v121_v10  ;;  %v1694_v16 = vmul.f32 -1.442695, %v121_v10 }
  0xd1   :  { %v118_v12 = vpop.f32.mrf.mxu0  ;;  %v212_v39 = vpop.f32.mrf.mxu1 }
  0xd2   :  { %2027 = vpow2.f32 %v1694_v16 }
  0xd3   :  { %v1829_v13 = vpop.f32.mrf.mxu0  ;;  %v1837_v40 = vpop.f32.mrf.mxu1 }
  0xdd   :  { %v2026_v14 = vpop.eup %2025 }
  0xde   :  { %135 = vrot.lane.b32.xlu0 %v2026_v14, %s2166_s27 }
  0xdf   :  { %v2028_v17 = vpop.eup %2027 }
  0xe0   :  { %v125_v18 = vadd.f32 1.0, %v2028_v17 }
  0xe2   :  { %130 = vrot.lane.b32.xlu0 %v53_v15, %s2166_s27  ;;  %2029 = vrcp.f32 %v125_v18 }
  0xef   :  { %v2030_v19 = vpop.eup %2029 }
 0x150   :  { %v136_v20 = vpop.permute.xlu0 %135 }
 0x151   :  { %v138_v21 = vmul.f32 %v2030_v19, %v136_v20 }
 0x153   :  { %140 = vrot.lane.b32.xlu1 %v138_v21, %s2166_s27 }
 0x154   :  { %v131_v22 = vpop.permute.xlu0 %130 }
 0x155   :  { %v133_v23 = vmul.f32 %v2030_v19, %v131_v22 }
 0x1c5   :  { %v141_v24 = vpop.permute.xlu1 %140 }
 0x1c6   :  { %v2266_v25 = vadd.f32 %v141_v24, %v133_v23 }
 0x1c8   :  { %2031 = vtanh.f32 %v2266_v25 }
 0x1d5   :  { %v2032_v31 = vpop.eup %2031 }
 0x1d6   :  { %146 = vrot.lane.b32.xlu1 %v2032_v31, %s2166_s27 }
 0x248   :  { %v147_v34 = vpop.permute.xlu1 %146 }
 0x249   :  { %v149_v35 = vmul.f32 %v2030_v19, %v147_v34 }
 0x24b   :  { %v150_v36 = vpack.c.bf16 %v149_v35, %v149_v35 }
 0x24d   :  { %216 = vrot.lane.b32.xlu0 %v150_v36, %s2167_s18 }
 0x2bf   :  { %v217_v41 = vpop.permute.xlu0 %216 }
 0x2c0   :  { %1843 = vmatmul.mubr.msk.bf16.vlgmr.msra.gmra.mxu0 %vm44_vm1, %v217_v41  ;;  %1851 = vmatmul.mubr.msk.bf16.vlgmr.msra.gmra.mxu1 %vm44_vm1, %v217_v41  ;;  %v497_v41 = vunpack.c.h.bf16 %v2331_v43 }
 0x2c1   :  { %1863 = vmatpush3.bf16.msra.mxu1 %v2287_v29  ;;  %1855 = vmatpush3.bf16.msra.mxu0 %v2275_v27 }
 0x2c2   :  { %1864 = vmatprep.subr.bf16.mxu1 %v2164_v0  ;;  %1856 = vmatprep.subr.bf16.mxu0 %v2164_v0 }
 0x2c3   :  { %1866 = vmatprep.mubr.msk.bf16.mxu1 %vm2165_vm0, %v2164_v0  ;;  %1858 = vmatprep.mubr.msk.bf16.mxu0 %vm2165_vm0, %v2164_v0 }
 0x2c5   :  { %1865 = vmatpush3.bf16.msra.mxu1 %v2294_v30  ;;  %1857 = vmatpush3.bf16.msra.mxu0 %v2281_v28 }
 0x2c6   :  { %1870 = vmatprep.subr.bf16.mxu0 %v2164_v0  ;;  %1878 = vmatprep.subr.bf16.mxu1 %v2164_v0 }
 0x380   :  { %v267_v46 = vpop.f32.mrf.mxu0  ;;  %v345_v47 = vpop.f32.mrf.mxu1 }
 0x381   :  { %v268_v48 = vadd.f32 %v267_v46, %v209_v37  ;;  %v351_v49 = vadd.f32 %v345_v47, %v310_v44 }
 0x382   :  { %v1844_v50 = vpop.f32.mrf.mxu0  ;;  %v1852_v51 = vpop.f32.mrf.mxu1 }
 0x383   :  { %v279_v52 = vadd.f32 %v2337_v45, %v268_v48  ;;  %2033 = vtanh.f32 %v351_v49  ;;  %v1705_v60 = vmul.f32 -1.442695, %v351_v49 }
 0x384   :  { %v270_v53 = vpop.f32.mrf.mxu0  ;;  %v348_v54 = vpop.f32.mrf.mxu1 }
 0x385   :  { %2035 = vtanh.f32 %v279_v52  ;;  %v1702_v61 = vmul.f32 -1.442695, %v279_v52 }
 0x386   :  { %v1845_v55 = vpop.f32.mrf.mxu0  ;;  %v1853_v56 = vpop.f32.mrf.mxu1  ;;  %2037 = vpow2.f32 %v1705_v60 }
 0x387   :  { %2039 = vpow2.f32 %v1702_v61 }
 0x390   :  { %v2034_v57 = vpop.eup %2033 }
 0x391   :  { %361 = vrot.lane.b32.xlu0 %v2034_v57, %s2166_s27 }
 0x392   :  { %v2036_v58 = vpop.eup %2035 }
 0x393   :  { %293 = vrot.lane.b32.xlu1 %v2036_v58, %s2166_s27  ;;  %v2038_v62 = vpop.eup %2037 }
 0x394   :  { %v2040_v63 = vpop.eup %2039  ;;  %v355_v3 = vadd.f32 1.0, %v2038_v62 }
 0x395   :  { %v283_v4 = vadd.f32 1.0, %v2040_v63 }
 0x396   :  { %2041 = vrcp.f32 %v355_v3 }
 0x397   :  { %288 = vrot.lane.b32.xlu1 %v57_v59, %s2166_s27  ;;  %2043 = vrcp.f32 %v283_v4 }
 0x3a3   :  { %v2042_v5 = vpop.eup %2041 }
 0x3a4   :  { %v2044_v8 = vpop.eup %2043  ;;  %v359_v12 = vmul.f32 %v2042_v5, %v2266_v25 }
 0x403   :  { %v362_v6 = vpop.permute.xlu0 %361 }
 0x404   :  { %v364_v7 = vmul.f32 %v2042_v5, %v362_v6 }
 0x405   :  { %v294_v9 = vpop.permute.xlu1 %293 }
 0x406   :  { %v296_v10 = vmul.f32 %v2044_v8, %v294_v9  ;;  %366 = vrot.lane.b32.xlu1 %v364_v7, %s2166_s27 }
 0x408   :  { %298 = vrot.lane.b32.xlu0 %v296_v10, %s2166_s27 }
 0x409   :  { %v289_v11 = vpop.permute.xlu1 %288 }
 0x40a   :  { %v291_v14 = vmul.f32 %v2044_v8, %v289_v11 }
 0x478   :  { %v367_v13 = vpop.permute.xlu1 %366 }
 0x479   :  { %v2346_v15 = vadd.f32 %v367_v13, %v359_v12 }
 0x47a   :  { %v299_v16 = vpop.permute.xlu0 %298 }
 0x47b   :  { %2045 = vtanh.f32 %v2346_v15  ;;  %v2349_v17 = vadd.f32 %v299_v16, %v291_v14 }
 0x47d   :  { %2047 = vtanh.f32 %v2349_v17 }
 0x488   :  { %v2046_v18 = vpop.eup %2045 }
 0x489   :  { %372 = vrot.lane.b32.xlu1 %v2046_v18, %s2166_s27 }
 0x48a   :  { %v2048_v19 = vpop.eup %2047 }
 0x48b   :  { %304 = vrot.lane.b32.xlu0 %v2048_v19, %s2166_s27 }
 0x4fb   :  { %v373_v20 = vpop.permute.xlu1 %372 }
 0x4fc   :  { %v375_v21 = vmul.f32 %v2042_v5, %v373_v20  ;;  %v2419_v20 = vld [vmem:[%s2651_s0 + $0xc] sm:$0xff]  }
 0x4fd   :  { %v305_v22 = vpop.permute.xlu0 %304 }
 0x4fe   :  { %v376_v23 = vpack.c.bf16 %v375_v21, %v375_v21  ;;  %v307_v24 = vmul.f32 %v2044_v8, %v305_v22  ;;  %v684_v22 = vunpack.c.l.bf16 %v2419_v20 }
 0x500   :  { %v377_v25 = vpack.c.bf16 %v307_v24, %v307_v24  ;;  %425 = vrot.lane.b32.xlu1 %v376_v23, %s2167_s18 }
 0x502   :  { %379 = vrot.lane.b32.xlu0 %v377_v25, %s2167_s18 }
 0x572   :  { %v426_v26 = vpop.permute.xlu1 %425 }
 0x573   :  { %1867 = vmatmul.mubr.msk.bf16.vlgmr.msra.gmra.mxu1 %vm44_vm1, %v426_v26 }
 0x574   :  { %v380_v31 = vpop.permute.xlu0 %379  ;;  %1879 = vmatpush3.bf16.msra.mxu1 %v2275_v27  ;;  %1882 = vmatprep.mubr.msk.bf16.mxu1 %vm2165_vm0, %v2164_v0 }
 0x575   :  { %1859 = vmatmul.mubr.msk.bf16.vlgmr.msra.gmra.mxu0 %vm44_vm1, %v380_v31  ;;  %1880 = vmatprep.subr.bf16.mxu1 %v2164_v0 }
 0x576   :  { %1871 = vmatpush3.bf16.msra.mxu0 %v2233_v1  ;;  %1874 = vmatprep.mubr.msk.bf16.mxu0 %vm2165_vm0, %v2164_v0 }
 0x577   :  { %1872 = vmatprep.subr.bf16.mxu0 %v2164_v0 }
 0x578   :  { %1881 = vmatpush3.bf16.msra.mxu1 %v2281_v28 }
 0x579   :  { %1894 = vmatprep.subr.bf16.mxu1 %v2164_v0 }
 0x57a   :  { %1873 = vmatpush3.bf16.msra.mxu0 %v2244_v2 }
 0x57b   :  { %1886 = vmatprep.subr.bf16.mxu0 %v2164_v0 }
 0x57d   :  { %1875 = vmatmul.mubr.msk.bf16.vlgmr.msra.gmra.mxu0 %vm44_vm1, %v426_v26 }
 0x57e   :  { %1887 = vmatpush3.bf16.msra.mxu0 %v2287_v29  ;;  %1890 = vmatprep.mubr.msk.bf16.mxu0 %vm2165_vm0, %v2164_v0 }
 0x57f   :  { %1888 = vmatprep.subr.bf16.mxu0 %v2164_v0 }
 0x582   :  { %1889 = vmatpush3.bf16.msra.mxu0 %v2294_v30 }
 0x583   :  { %1902 = vmatprep.subr.bf16.mxu0 %v2164_v0 }
 0x633   :  { %v464_v32 = vpop.f32.mrf.mxu1 }
 0x635   :  { %v418_v33 = vpop.f32.mrf.mxu0  ;;  %v1868_v34 = vpop.f32.mrf.mxu1 }
 0x636   :  { %v465_v35 = vadd.f32 %v464_v32, %v418_v33 }
 0x637   :  { %v1860_v36 = vpop.f32.mrf.mxu0  ;;  %v467_v37 = vpop.f32.mrf.mxu1 }
 0x638   :  { %v470_v38 = vadd.f32 %v2337_v45, %v465_v35 }
 0x639   :  { %v421_v39 = vpop.f32.mrf.mxu0  ;;  %v1869_v40 = vpop.f32.mrf.mxu1 }
 0x63a   :  { %2049 = vtanh.f32 %v470_v38  ;;  %v1708_v52 = vmul.f32 -1.442695, %v470_v38 }
 0x63b   :  { %v1861_v42 = vpop.f32.mrf.mxu0 }
 0x63d   :  { %v532_v44 = vpop.f32.mrf.mxu0 }
 0x63e   :  { %v538_v46 = vadd.f32 %v532_v44, %v497_v41 }
 0x63f   :  { %v1876_v47 = vpop.f32.mrf.mxu0 }
 0x640   :  { %2051 = vtanh.f32 %v538_v46  ;;  %v1711_v53 = vmul.f32 -1.442695, %v538_v46 }
 0x641   :  { %v535_v48 = vpop.f32.mrf.mxu0  ;;  %2053 = vpow2.f32 %v1708_v52 }
 0x642   :  { %2055 = vpow2.f32 %v1711_v53 }
 0x643   :  { %v1877_v49 = vpop.f32.mrf.mxu0 }
 0x647   :  { %v2050_v50 = vpop.eup %2049 }
 0x648   :  { %480 = vrot.lane.b32.xlu0 %v2050_v50, %s2166_s27 }
 0x64d   :  { %v2052_v51 = vpop.eup %2051 }
 0x64e   :  { %548 = vrot.lane.b32.xlu1 %v2052_v51, %s2166_s27  ;;  %v2054_v54 = vpop.eup %2053 }
 0x64f   :  { %v474_v55 = vadd.f32 1.0, %v2054_v54  ;;  %v2056_v43 = vpop.eup %2055 }
 0x650   :  { %v542_v56 = vadd.f32 1.0, %v2056_v43 }
 0x651   :  { %2057 = vrcp.f32 %v474_v55 }
 0x652   :  { %2059 = vrcp.f32 %v542_v56 }
 0x65e   :  { %v2058_v57 = vpop.eup %2057 }
 0x65f   :  { %v2060_v60 = vpop.eup %2059  ;;  %v478_v63 = vmul.f32 %v2058_v57, %v2349_v17 }
 0x660   :  { %v546_v5 = vmul.f32 %v2060_v60, %v2346_v15 }
 0x6ba   :  { %v481_v58 = vpop.permute.xlu0 %480 }
 0x6bb   :  { %v483_v59 = vmul.f32 %v2058_v57, %v481_v58 }
 0x6bd   :  { %485 = vrot.lane.b32.xlu0 %v483_v59, %s2166_s27 }
 0x6c0   :  { %v549_v61 = vpop.permute.xlu1 %548 }
 0x6c1   :  { %v551_v62 = vmul.f32 %v2060_v60, %v549_v61 }
 0x6c3   :  { %553 = vrot.lane.b32.xlu1 %v551_v62, %s2166_s27 }
 0x72f   :  { %v486_v3 = vpop.permute.xlu0 %485 }
 0x730   :  { %v2384_v4 = vadd.f32 %v486_v3, %v478_v63 }
 0x732   :  { %2061 = vtanh.f32 %v2384_v4 }
 0x735   :  { %v554_v6 = vpop.permute.xlu1 %553 }
 0x736   :  { %v2388_v7 = vadd.f32 %v554_v6, %v546_v5 }
 0x738   :  { %2063 = vtanh.f32 %v2388_v7 }
 0x73f   :  { %v2062_v8 = vpop.eup %2061 }
 0x740   :  { %491 = vrot.lane.b32.xlu0 %v2062_v8, %s2166_s27 }
 0x745   :  { %v2064_v9 = vpop.eup %2063 }
 0x746   :  { %559 = vrot.lane.b32.xlu1 %v2064_v9, %s2166_s27 }
 0x7b2   :  { %v492_v10 = vpop.permute.xlu0 %491 }
 0x7b3   :  { %v494_v11 = vmul.f32 %v2058_v57, %v492_v10 }
 0x7b5   :  { %v564_v12 = vpack.c.bf16 %v494_v11, %v494_v11 }
 0x7b7   :  { %566 = vrot.lane.b32.xlu0 %v564_v12, %s2167_s18 }
 0x7b8   :  { %v560_v13 = vpop.permute.xlu1 %559 }
 0x7b9   :  { %v562_v14 = vmul.f32 %v2060_v60, %v560_v13 }
 0x7bb   :  { %v563_v16 = vpack.c.bf16 %v562_v14, %v562_v14 }
 0x7bd   :  { %612 = vrot.lane.b32.xlu1 %v563_v16, %s2167_s18 }
 0x829   :  { %v567_v15 = vpop.permute.xlu0 %566 }
 0x82a   :  { %1883 = vmatmul.mubr.msk.bf16.vlgmr.msra.gmra.mxu1 %vm44_vm1, %v567_v15 }
 0x82b   :  { %1895 = vmatpush3.bf16.msra.mxu1 %v2233_v1  ;;  %1898 = vmatprep.mubr.msk.bf16.mxu1 %vm2165_vm0, %v2164_v0 }
 0x82c   :  { %1896 = vmatprep.subr.bf16.mxu1 %v2164_v0 }
 0x82f   :  { %1897 = vmatpush3.bf16.msra.mxu1 %v2244_v2  ;;  %v613_v17 = vpop.permute.xlu1 %612 }
 0x830   :  { %1891 = vmatmul.mubr.msk.bf16.vlgmr.msra.gmra.mxu0 %vm44_vm1, %v613_v17  ;;  %1910 = vmatprep.subr.bf16.mxu1 %v2164_v0 }
 0x831   :  { %1903 = vmatpush3.bf16.msra.mxu0 %v2275_v27  ;;  %1906 = vmatprep.mubr.msk.bf16.mxu0 %vm2165_vm0, %v2164_v0 }
 0x832   :  { %1899 = vmatmul.mubr.msk.bf16.vlgmr.msra.gmra.mxu1 %vm44_vm1, %v613_v17  ;;  %1904 = vmatprep.subr.bf16.mxu0 %v2164_v0  ;;  %v871_v17 = vunpack.c.h.bf16 %v2419_v20 }
 0x833   :  { %1911 = vmatpush3.bf16.msra.mxu1 %v2287_v29  ;;  %1914 = vmatprep.mubr.msk.bf16.mxu1 %vm2165_vm0, %v2164_v0 }
 0x834   :  { %1912 = vmatprep.subr.bf16.mxu1 %v2164_v0 }
 0x835   :  { %1905 = vmatpush3.bf16.msra.mxu0 %v2281_v28 }
 0x836   :  { %1918 = vmatprep.subr.bf16.mxu0 %v2164_v0 }
 0x837   :  { %1913 = vmatpush3.bf16.msra.mxu1 %v2294_v30 }
 0x838   :  { %1926 = vmatprep.subr.bf16.mxu1 %v2164_v0 }
 0x8ea   :  { %v605_v18 = vpop.f32.mrf.mxu1 }
 0x8ec   :  { %v1884_v19 = vpop.f32.mrf.mxu1 }
 0x8ee   :  { %v608_v21 = vpop.f32.mrf.mxu1 }
 0x8f0   :  { %v1885_v23 = vpop.f32.mrf.mxu1  ;;  %v651_v24 = vpop.f32.mrf.mxu0 }
 0x8f1   :  { %v652_v25 = vadd.f32 %v651_v24, %v605_v18 }
 0x8f2   :  { %v1892_v26 = vpop.f32.mrf.mxu0  ;;  %v719_v31 = vpop.f32.mrf.mxu1 }
 0x8f3   :  { %v657_v32 = vadd.f32 %v2337_v45, %v652_v25  ;;  %v725_v33 = vadd.f32 %v719_v31, %v684_v22 }
 0x8f4   :  { %v654_v34 = vpop.f32.mrf.mxu0  ;;  %v1900_v35 = vpop.f32.mrf.mxu1 }
 0x8f5   :  { %2065 = vtanh.f32 %v657_v32  ;;  %v1714_v41 = vmul.f32 -1.442695, %v657_v32  ;;  %v1717_v42 = vmul.f32 -1.442695, %v725_v33 }
 0x8f6   :  { %2067 = vtanh.f32 %v725_v33  ;;  %v1893_v36 = vpop.f32.mrf.mxu0  ;;  %v722_v37 = vpop.f32.mrf.mxu1 }
 0x8f7   :  { %2069 = vpow2.f32 %v1714_v41 }
 0x8f8   :  { %v1901_v38 = vpop.f32.mrf.mxu1  ;;  %2071 = vpow2.f32 %v1717_v42 }
 0x902   :  { %v2066_v39 = vpop.eup %2065 }
 0x903   :  { %v2068_v40 = vpop.eup %2067  ;;  %667 = vrot.lane.b32.xlu0 %v2066_v39, %s2166_s27 }
 0x904   :  { %735 = vrot.lane.b32.xlu1 %v2068_v40, %s2166_s27  ;;  %v2070_v44 = vpop.eup %2069 }
 0x905   :  { %v2072_v46 = vpop.eup %2071  ;;  %v661_v47 = vadd.f32 1.0, %v2070_v44 }
 0x906   :  { %v729_v48 = vadd.f32 1.0, %v2072_v46 }
 0x907   :  { %2073 = vrcp.f32 %v661_v47 }
 0x908   :  { %2075 = vrcp.f32 %v729_v48 }
 0x914   :  { %v2074_v49 = vpop.eup %2073 }
 0x915   :  { %v2076_v51 = vpop.eup %2075  ;;  %v665_v55 = vmul.f32 %v2074_v49, %v2384_v4 }
 0x916   :  { %v733_v43 = vmul.f32 %v2076_v51, %v2388_v7 }
 0x975   :  { %v668_v50 = vpop.permute.xlu0 %667 }
 0x976   :  { %v736_v52 = vpop.permute.xlu1 %735  ;;  %v670_v53 = vmul.f32 %v2074_v49, %v668_v50 }
 0x977   :  { %v738_v54 = vmul.f32 %v2076_v51, %v736_v52 }
 0x978   :  { %672 = vrot.lane.b32.xlu0 %v670_v53, %s2166_s27 }
 0x979   :  { %740 = vrot.lane.b32.xlu1 %v738_v54, %s2166_s27 }
 0x9ea   :  { %v673_v56 = vpop.permute.xlu0 %672 }
 0x9eb   :  { %v741_v57 = vpop.permute.xlu1 %740  ;;  %v2429_v58 = vadd.f32 %v673_v56, %v665_v55 }
 0x9ec   :  { %v2431_v59 = vadd.f32 %v741_v57, %v733_v43 }
 0x9ed   :  { %2077 = vtanh.f32 %v2429_v58 }
 0x9ee   :  { %2079 = vtanh.f32 %v2431_v59 }
 0x9fa   :  { %v2078_v60 = vpop.eup %2077 }
 0x9fb   :  { %v2080_v61 = vpop.eup %2079  ;;  %678 = vrot.lane.b32.xlu0 %v2078_v60, %s2166_s27 }
 0x9fc   :  { %746 = vrot.lane.b32.xlu1 %v2080_v61, %s2166_s27 }
 0xa6d   :  { %v679_v62 = vpop.permute.xlu0 %678 }
 0xa6e   :  { %v747_v63 = vpop.permute.xlu1 %746  ;;  %v681_v3 = vmul.f32 %v2074_v49, %v679_v62  ;;  %v2502_v62 = vld [vmem:[%s2651_s0 + $0x14] sm:$0xff]  }
 0xa6f   :  { %v749_v4 = vmul.f32 %v2076_v51, %v747_v63 }
 0xa70   :  { %v751_v5 = vpack.c.bf16 %v681_v3, %v681_v3 }
 0xa71   :  { %v750_v6 = vpack.c.bf16 %v749_v4, %v749_v4  ;;  %v1058_v4 = vunpack.c.l.bf16 %v2502_v62 }
 0xa72   :  { %753 = vrot.lane.b32.xlu0 %v751_v5, %s2167_s18 }
 0xa73   :  { %799 = vrot.lane.b32.xlu1 %v750_v6, %s2167_s18 }
 0xae4   :  { %v754_v7 = vpop.permute.xlu0 %753 }
 0xae5   :  { %v800_v8 = vpop.permute.xlu1 %799  ;;  %1907 = vmatmul.mubr.msk.bf16.vlgmr.msra.gmra.mxu0 %vm44_vm1, %v754_v7 }
 0xae6   :  { %1915 = vmatmul.mubr.msk.bf16.vlgmr.msra.gmra.mxu1 %vm44_vm1, %v800_v8  ;;  %1919 = vmatpush3.bf16.msra.mxu0 %v2233_v1 }
 0xae7   :  { %1920 = vmatprep.subr.bf16.mxu0 %v2164_v0  ;;  %1922 = vmatprep.mubr.msk.bf16.mxu0 %vm2165_vm0, %v2164_v0 }
 0xae8   :  { %1927 = vmatpush3.bf16.msra.mxu1 %v2275_v27  ;;  %1930 = vmatprep.mubr.msk.bf16.mxu1 %vm2165_vm0, %v2164_v0 }
 0xae9   :  { %1928 = vmatprep.subr.bf16.mxu1 %v2164_v0 }
 0xaea   :  { %1921 = vmatpush3.bf16.msra.mxu0 %v2244_v2 }
 0xaeb   :  { %1934 = vmatprep.subr.bf16.mxu0 %v2164_v0 }
 0xaec   :  { %1929 = vmatpush3.bf16.msra.mxu1 %v2281_v28 }
 0xaed   :  { %1923 = vmatmul.mubr.msk.bf16.vlgmr.msra.gmra.mxu0 %vm44_vm1, %v800_v8  ;;  %1942 = vmatprep.subr.bf16.mxu1 %v2164_v0 }
 0xaee   :  { %1935 = vmatpush3.bf16.msra.mxu0 %v2287_v29  ;;  %1938 = vmatprep.mubr.msk.bf16.mxu0 %vm2165_vm0, %v2164_v0 }
 0xaef   :  { %1936 = vmatprep.subr.bf16.mxu0 %v2164_v0 }
 0xaf2   :  { %1937 = vmatpush3.bf16.msra.mxu0 %v2294_v30 }
 0xaf3   :  { %1950 = vmatprep.subr.bf16.mxu0 %v2164_v0 }
 0xba5   :  { %v792_v9 = vpop.f32.mrf.mxu0 }
 0xba6   :  { %v838_v10 = vpop.f32.mrf.mxu1 }
 0xba7   :  { %v839_v11 = vadd.f32 %v838_v10, %v792_v9  ;;  %v1908_v12 = vpop.f32.mrf.mxu0 }
 0xba8   :  { %v1916_v13 = vpop.f32.mrf.mxu1 }
 0xba9   :  { %v844_v14 = vadd.f32 %v2337_v45, %v839_v11  ;;  %v795_v16 = vpop.f32.mrf.mxu0 }
 0xbaa   :  { %v841_v15 = vpop.f32.mrf.mxu1 }
 0xbab   :  { %2081 = vtanh.f32 %v844_v14  ;;  %v1909_v18 = vpop.f32.mrf.mxu0  ;;  %v1720_v32 = vmul.f32 -1.442695, %v844_v14 }
 0xbac   :  { %v1917_v19 = vpop.f32.mrf.mxu1 }
 0xbad   :  { %v906_v21 = vpop.f32.mrf.mxu0 }
 0xbae   :  { %v912_v22 = vadd.f32 %v906_v21, %v871_v17 }
 0xbaf   :  { %v1924_v23 = vpop.f32.mrf.mxu0 }
 0xbb0   :  { %2083 = vtanh.f32 %v912_v22  ;;  %v1723_v33 = vmul.f32 -1.442695, %v912_v22 }
 0xbb1   :  { %v909_v24 = vpop.f32.mrf.mxu0  ;;  %2085 = vpow2.f32 %v1720_v32 }
 0xbb2   :  { %2087 = vpow2.f32 %v1723_v33 }
 0xbb3   :  { %v1925_v25 = vpop.f32.mrf.mxu0 }
 0xbb8   :  { %v2082_v26 = vpop.eup %2081 }
 0xbb9   :  { %854 = vrot.lane.b32.xlu0 %v2082_v26, %s2166_s27 }
 0xbbd   :  { %v2084_v31 = vpop.eup %2083 }
 0xbbe   :  { %922 = vrot.lane.b32.xlu1 %v2084_v31, %s2166_s27  ;;  %v2086_v20 = vpop.eup %2085 }
 0xbbf   :  { %v848_v34 = vadd.f32 1.0, %v2086_v20  ;;  %v2088_v35 = vpop.eup %2087 }
 0xbc0   :  { %v916_v36 = vadd.f32 1.0, %v2088_v35 }
 0xbc1   :  { %2089 = vrcp.f32 %v848_v34 }
 0xbc2   :  { %2091 = vrcp.f32 %v916_v36 }
 0xbce   :  { %v2090_v37 = vpop.eup %2089 }
 0xbcf   :  { %v2092_v40 = vpop.eup %2091  ;;  %v852_v44 = vmul.f32 %v2090_v37, %v2429_v58 }
 0xbd0   :  { %v920_v48 = vmul.f32 %v2092_v40, %v2431_v59 }
 0xc2b   :  { %v855_v38 = vpop.permute.xlu0 %854 }
 0xc2c   :  { %v857_v39 = vmul.f32 %v2090_v37, %v855_v38 }
 0xc2e   :  { %859 = vrot.lane.b32.xlu0 %v857_v39, %s2166_s27 }
 0xc30   :  { %v923_v41 = vpop.permute.xlu1 %922 }
 0xc31   :  { %v925_v42 = vmul.f32 %v2092_v40, %v923_v41 }
 0xc33   :  { %927 = vrot.lane.b32.xlu1 %v925_v42, %s2166_s27 }
 0xca0   :  { %v860_v46 = vpop.permute.xlu0 %859 }
 0xca1   :  { %v2467_v47 = vadd.f32 %v860_v46, %v852_v44 }
 0xca3   :  { %2093 = vtanh.f32 %v2467_v47 }
 0xca5   :  { %v928_v49 = vpop.permute.xlu1 %927 }
 0xca6   :  { %v2471_v50 = vadd.f32 %v928_v49, %v920_v48 }
 0xca8   :  { %2095 = vtanh.f32 %v2471_v50 }
 0xcb0   :  { %v2094_v51 = vpop.eup %2093 }
 0xcb1   :  { %865 = vrot.lane.b32.xlu0 %v2094_v51, %s2166_s27 }
 0xcb5   :  { %v2096_v52 = vpop.eup %2095 }
 0xcb6   :  { %933 = vrot.lane.b32.xlu1 %v2096_v52, %s2166_s27 }
 0xd23   :  { %v866_v53 = vpop.permute.xlu0 %865 }
 0xd24   :  { %v868_v54 = vmul.f32 %v2090_v37, %v866_v53 }
 0xd26   :  { %v938_v55 = vpack.c.bf16 %v868_v54, %v868_v54 }
 0xd28   :  { %940 = vrot.lane.b32.xlu0 %v938_v55, %s2167_s18  ;;  %v934_v43 = vpop.permute.xlu1 %933 }
 0xd29   :  { %v936_v56 = vmul.f32 %v2092_v40, %v934_v43 }
 0xd2b   :  { %v937_v57 = vpack.c.bf16 %v936_v56, %v936_v56 }
 0xd2d   :  { %986 = vrot.lane.b32.xlu1 %v937_v57, %s2167_s18 }
 0xd9a   :  { %v941_v58 = vpop.permute.xlu0 %940 }
 0xd9b   :  { %1931 = vmatmul.mubr.msk.bf16.vlgmr.msra.gmra.mxu1 %vm44_vm1, %v941_v58 }
 0xd9c   :  { %1943 = vmatpush3.bf16.msra.mxu1 %v2233_v1  ;;  %1946 = vmatprep.mubr.msk.bf16.mxu1 %vm2165_vm0, %v2164_v0 }
 0xd9d   :  { %1944 = vmatprep.subr.bf16.mxu1 %v2164_v0 }
 0xd9f   :  { %v987_v59 = vpop.permute.xlu1 %986 }
 0xda0   :  { %1945 = vmatpush3.bf16.msra.mxu1 %v2244_v2  ;;  %1939 = vmatmul.mubr.msk.bf16.vlgmr.msra.gmra.mxu0 %vm44_vm1, %v987_v59 }
 0xda1   :  { %1958 = vmatprep.subr.bf16.mxu1 %v2164_v0  ;;  %1951 = vmatpush3.bf16.msra.mxu0 %v2275_v27 }
 0xda2   :  { %1952 = vmatprep.subr.bf16.mxu0 %v2164_v0  ;;  %1954 = vmatprep.mubr.msk.bf16.mxu0 %vm2165_vm0, %v2164_v0 }
 0xda3   :  { %1947 = vmatmul.mubr.msk.bf16.vlgmr.msra.gmra.mxu1 %vm44_vm1, %v987_v59 }
 0xda4   :  { %1959 = vmatpush3.bf16.msra.mxu1 %v2287_v29  ;;  %1962 = vmatprep.mubr.msk.bf16.mxu1 %vm2165_vm0, %v2164_v0 }
 0xda5   :  { %1960 = vmatprep.subr.bf16.mxu1 %v2164_v0  ;;  %1953 = vmatpush3.bf16.msra.mxu0 %v2281_v28 }
 0xda6   :  { %1966 = vmatprep.subr.bf16.mxu0 %v2164_v0 }
 0xda8   :  { %1961 = vmatpush3.bf16.msra.mxu1 %v2294_v30 }
 0xda9   :  { %1974 = vmatprep.subr.bf16.mxu1 %v2164_v0 }
 0xe5b   :  { %v979_v60 = vpop.f32.mrf.mxu1 }
 0xe5d   :  { %v1932_v61 = vpop.f32.mrf.mxu1 }
 0xe5f   :  { %v982_v63 = vpop.f32.mrf.mxu1 }
 0xe60   :  { %v1025_v3 = vpop.f32.mrf.mxu0 }
 0xe61   :  { %v1933_v5 = vpop.f32.mrf.mxu1  ;;  %v1026_v6 = vadd.f32 %v1025_v3, %v979_v60 }
 0xe62   :  { %v1940_v7 = vpop.f32.mrf.mxu0 }
 0xe63   :  { %v1031_v8 = vadd.f32 %v2337_v45, %v1026_v6  ;;  %v1093_v9 = vpop.f32.mrf.mxu1 }
 0xe64   :  { %v1099_v10 = vadd.f32 %v1093_v9, %v1058_v4  ;;  %v1028_v11 = vpop.f32.mrf.mxu0 }
 0xe65   :  { %2097 = vtanh.f32 %v1031_v8  ;;  %v1948_v12 = vpop.f32.mrf.mxu1  ;;  %v1726_v18 = vmul.f32 -1.442695, %v1031_v8 }
 0xe66   :  { %2099 = vtanh.f32 %v1099_v10  ;;  %v1941_v13 = vpop.f32.mrf.mxu0  ;;  %v1729_v19 = vmul.f32 -1.442695, %v1099_v10 }
 0xe67   :  { %v1096_v14 = vpop.f32.mrf.mxu1  ;;  %2101 = vpow2.f32 %v1726_v18 }
 0xe68   :  { %2103 = vpow2.f32 %v1729_v19 }
 0xe69   :  { %v1949_v16 = vpop.f32.mrf.mxu1 }
 0xe72   :  { %v2098_v15 = vpop.eup %2097 }
 0xe73   :  { %v2100_v17 = vpop.eup %2099  ;;  %1041 = vrot.lane.b32.xlu0 %v2098_v15, %s2166_s27 }
 0xe74   :  { %1109 = vrot.lane.b32.xlu1 %v2100_v17, %s2166_s27  ;;  %v2102_v21 = vpop.eup %2101 }
 0xe75   :  { %v2104_v22 = vpop.eup %2103  ;;  %v1035_v23 = vadd.f32 1.0, %v2102_v21 }
 0xe76   :  { %v1103_v24 = vadd.f32 1.0, %v2104_v22 }
 0xe77   :  { %2105 = vrcp.f32 %v1035_v23 }
 0xe78   :  { %2107 = vrcp.f32 %v1103_v24 }
 0xe84   :  { %v2106_v25 = vpop.eup %2105 }
 0xe85   :  { %v2108_v31 = vpop.eup %2107  ;;  %v1039_v34 = vmul.f32 %v2106_v25, %v2467_v47 }
 0xe86   :  { %v1107_v35 = vmul.f32 %v2108_v31, %v2471_v50 }
 0xee5   :  { %v1042_v26 = vpop.permute.xlu0 %1041 }
 0xee6   :  { %v1110_v32 = vpop.permute.xlu1 %1109  ;;  %v1044_v33 = vmul.f32 %v2106_v25, %v1042_v26 }
 0xee7   :  { %v1112_v20 = vmul.f32 %v2108_v31, %v1110_v32 }
 0xee8   :  { %1046 = vrot.lane.b32.xlu0 %v1044_v33, %s2166_s27 }
 0xee9   :  { %1114 = vrot.lane.b32.xlu1 %v1112_v20, %s2166_s27  ;;  %v2157_v20 = vld [vmem:[%s2648_s1 + $0x8] sm:$0xff]  }
 0xf5a   :  { %v1047_v36 = vpop.permute.xlu0 %1046 }
 0xf5b   :  { %v1115_v37 = vpop.permute.xlu1 %1114  ;;  %v2512_v38 = vadd.f32 %v1047_v36, %v1039_v34  ;;  %v2159_v36 = vld [vmem:[%s2652_s3 + $0x8] sm:$0xff]  }
 0xf5c   :  { %v2514_v39 = vadd.f32 %v1115_v37, %v1107_v35  ;;  %v2158_v35 = vld [vmem:[%s2648_s1] sm:$0xff]   ;;  %v2160_v37 = vld [vmem:[%s2653_s2 + $0x8] sm:$0xff]  }
 0xf5d   :  { %2109 = vtanh.f32 %v2512_v38 }
 0xf5e   :  { %2111 = vtanh.f32 %v2514_v39 }
 0xf6a   :  { %v2110_v40 = vpop.eup %2109 }
 0xf6b   :  { %v2112_v41 = vpop.eup %2111  ;;  %1052 = vrot.lane.b32.xlu0 %v2110_v40, %s2166_s27 }
 0xf6c   :  { %1120 = vrot.lane.b32.xlu1 %v2112_v41, %s2166_s27 }
 0xfdd   :  { %v1053_v42 = vpop.permute.xlu0 %1052 }
 0xfde   :  { %v1121_v44 = vpop.permute.xlu1 %1120  ;;  %v1055_v46 = vmul.f32 %v2106_v25, %v1053_v42  ;;  %v1739_v42 = vld [vmem:[%s2651_s0 + $0x1c] sm:$0xf] }
 0xfdf   :  { %v1123_v47 = vmul.f32 %v2108_v31, %v1121_v44 }
 0xfe0   :  { %v1125_v48 = vpack.c.bf16 %v1055_v46, %v1055_v46 }
 0xfe1   :  { %v1124_v49 = vpack.c.bf16 %v1123_v47, %v1123_v47  ;;  %v1432_v47 = vunpack.c.l.bf16 %v1739_v42 }
 0xfe2   :  { %1127 = vrot.lane.b32.xlu0 %v1125_v48, %s2167_s18 }
 0xfe3   :  { %1173 = vrot.lane.b32.xlu1 %v1124_v49, %s2167_s18 }
0x1054   :  { %v1128_v50 = vpop.permute.xlu0 %1127 }
0x1055   :  { %v1174_v51 = vpop.permute.xlu1 %1173  ;;  %1955 = vmatmul.mubr.msk.bf16.vlgmr.msra.gmra.mxu0 %vm44_vm1, %v1128_v50 }
0x1056   :  { %1963 = vmatmul.mubr.msk.bf16.vlgmr.msra.gmra.mxu1 %vm44_vm1, %v1174_v51  ;;  %1967 = vmatpush3.bf16.msra.mxu0 %v2233_v1 }
0x1057   :  { %1968 = vmatprep.subr.bf16.mxu0 %v2164_v0  ;;  %1970 = vmatprep.mubr.msk.bf16.mxu0 %vm2165_vm0, %v2164_v0 }
0x1058   :  { %1975 = vmatpush3.bf16.msra.mxu1 %v2275_v27  ;;  %1978 = vmatprep.mubr.msk.bf16.mxu1 %vm2165_vm0, %v2164_v0 }
0x1059   :  { %1976 = vmatprep.subr.bf16.mxu1 %v2164_v0 }
0x105a   :  { %1969 = vmatpush3.bf16.msra.mxu0 %v2244_v2 }
0x105b   :  { %1982 = vmatprep.subr.bf16.mxu0 %v2164_v0 }
0x105c   :  { %1977 = vmatpush3.bf16.msra.mxu1 %v2281_v28 }
0x105d   :  { %1971 = vmatmul.mubr.msk.bf16.vlgmr.msra.gmra.mxu0 %vm44_vm1, %v1174_v51  ;;  %1990 = vmatprep.subr.bf16.mxu1 %v2164_v0 }
0x105e   :  { %1983 = vmatpush3.bf16.msra.mxu0 %v2287_v29  ;;  %1986 = vmatprep.mubr.msk.bf16.mxu0 %vm2165_vm0, %v2164_v0  ;;  %v1245_v29 = vunpack.c.h.bf16 %v2502_v62 }
0x105f   :  { %1984 = vmatprep.subr.bf16.mxu0 %v2164_v0 }
0x1062   :  { %1985 = vmatpush3.bf16.msra.mxu0 %v2294_v30 }
0x1063   :  { %1998 = vmatprep.subr.bf16.mxu0 %v2164_v0 }
0x1115   :  { %v1166_v1 = vpop.f32.mrf.mxu0 }
0x1116   :  { %v1212_v2 = vpop.f32.mrf.mxu1 }
0x1117   :  { %v1213_v27 = vadd.f32 %v1212_v2, %v1166_v1  ;;  %v1956_v52 = vpop.f32.mrf.mxu0 }
0x1118   :  { %v1964_v28 = vpop.f32.mrf.mxu1 }
0x1119   :  { %v1218_v53 = vadd.f32 %v2337_v45, %v1213_v27  ;;  %v1169_v54 = vpop.f32.mrf.mxu0 }
0x111a   :  { %v1215_v55 = vpop.f32.mrf.mxu1 }
0x111b   :  { %2113 = vtanh.f32 %v1218_v53  ;;  %v1957_v43 = vpop.f32.mrf.mxu0  ;;  %v1732_v3 = vmul.f32 -1.442695, %v1218_v53 }
0x111c   :  { %v1965_v56 = vpop.f32.mrf.mxu1 }
0x111d   :  { %v1280_v57 = vpop.f32.mrf.mxu0 }
0x111e   :  { %v1286_v58 = vadd.f32 %v1280_v57, %v1245_v29 }
0x111f   :  { %v1972_v59 = vpop.f32.mrf.mxu0 }
0x1120   :  { %2115 = vtanh.f32 %v1286_v58  ;;  %v1735_v4 = vmul.f32 -1.442695, %v1286_v58 }
0x1121   :  { %v1283_v30 = vpop.f32.mrf.mxu0  ;;  %2117 = vpow2.f32 %v1732_v3 }
0x1122   :  { %2119 = vpow2.f32 %v1735_v4 }
0x1123   :  { %v1973_v60 = vpop.f32.mrf.mxu0 }
0x1128   :  { %v2114_v61 = vpop.eup %2113 }
0x1129   :  { %1228 = vrot.lane.b32.xlu0 %v2114_v61, %s2166_s27 }
0x112d   :  { %v2116_v63 = vpop.eup %2115 }
0x112e   :  { %1296 = vrot.lane.b32.xlu1 %v2116_v63, %s2166_s27  ;;  %v2118_v62 = vpop.eup %2117 }
0x112f   :  { %v1222_v5 = vadd.f32 1.0, %v2118_v62  ;;  %v2120_v6 = vpop.eup %2119 }
0x1130   :  { %v1290_v7 = vadd.f32 1.0, %v2120_v6 }
0x1131   :  { %2121 = vrcp.f32 %v1222_v5 }
0x1132   :  { %2123 = vrcp.f32 %v1290_v7 }
0x113e   :  { %v2122_v8 = vpop.eup %2121 }
0x113f   :  { %v2124_v11 = vpop.eup %2123  ;;  %v1226_v14 = vmul.f32 %v2122_v8, %v2512_v38  ;;  %v2161_v38 = vld [vmem:[%s2652_s3] sm:$0xff]  }
0x1140   :  { %v1294_v17 = vmul.f32 %v2124_v11, %v2514_v39  ;;  %v2162_v39 = vld [vmem:[%s2653_s2] sm:$0xff]  }
0x119b   :  { %v1229_v9 = vpop.permute.xlu0 %1228 }
0x119c   :  { %v1231_v10 = vmul.f32 %v2122_v8, %v1229_v9 }
0x119e   :  { %1233 = vrot.lane.b32.xlu0 %v1231_v10, %s2166_s27 }
0x11a0   :  { %v1297_v12 = vpop.permute.xlu1 %1296 }
0x11a1   :  { %v1299_v13 = vmul.f32 %v2124_v11, %v1297_v12 }
0x11a3   :  { %1301 = vrot.lane.b32.xlu1 %v1299_v13, %s2166_s27 }
0x1210   :  { %v1234_v16 = vpop.permute.xlu0 %1233 }
0x1211   :  { %v2550_v15 = vadd.f32 %v1234_v16, %v1226_v14 }
0x1213   :  { %2125 = vtanh.f32 %v2550_v15 }
0x1215   :  { %v1302_v18 = vpop.permute.xlu1 %1301 }
0x1216   :  { %v2554_v19 = vadd.f32 %v1302_v18, %v1294_v17 }
0x1218   :  { %2127 = vtanh.f32 %v2554_v19 }
0x1220   :  { %v2126_v21 = vpop.eup %2125 }
0x1221   :  { %1239 = vrot.lane.b32.xlu0 %v2126_v21, %s2166_s27 }
0x1225   :  { %v2128_v22 = vpop.eup %2127 }
0x1226   :  { %1307 = vrot.lane.b32.xlu1 %v2128_v22, %s2166_s27 }
0x1293   :  { %v1240_v23 = vpop.permute.xlu0 %1239 }
0x1294   :  { %v1242_v24 = vmul.f32 %v2122_v8, %v1240_v23 }
0x1296   :  { %v1312_v25 = vpack.c.bf16 %v1242_v24, %v1242_v24 }
0x1298   :  { %1314 = vrot.lane.b32.xlu0 %v1312_v25, %s2167_s18  ;;  %v1308_v26 = vpop.permute.xlu1 %1307  ;;  %v2163_v25 = vld [vmem:[%s2654_s4] ss:$0 sm:$0xff] }
0x1299   :  { %v1310_v31 = vmul.f32 %v2124_v11, %v1308_v26 }
0x129b   :  { %v1311_v32 = vpack.c.bf16 %v1310_v31, %v1310_v31 }
0x129d   :  { %1360 = vrot.lane.b32.xlu1 %v1311_v32, %s2167_s18 }
0x130a   :  { %v1315_v33 = vpop.permute.xlu0 %1314 }
0x130b   :  { %1979 = vmatmul.mubr.msk.bf16.vlgmr.msra.gmra.mxu1 %vm44_vm1, %v1315_v33 }
0x130c   :  { %1991 = vmatpush3.bf16.msra.mxu1 %v2157_v20  ;;  %1994 = vmatprep.mubr.msk.bf16.mxu1 %vm2165_vm0, %v2164_v0 }
0x130d   :  { %1992 = vmatprep.subr.bf16.mxu1 %v2164_v0 }
0x130f   :  { %v1361_v34 = vpop.permute.xlu1 %1360 }
0x1310   :  { %1993 = vmatpush3.bf16.msra.mxu1 %v2158_v35  ;;  %1987 = vmatmul.mubr.msk.bf16.vlgmr.msra.gmra.mxu0 %vm44_vm1, %v1361_v34 }
0x1311   :  { %2006 = vmatprep.subr.bf16.mxu1 %v2164_v0  ;;  %1999 = vmatpush3.bf16.msra.mxu0 %v2159_v36 }
0x1312   :  { %2000 = vmatprep.subr.bf16.mxu0 %v2164_v0  ;;  %2002 = vmatprep.mubr.msk.bf16.mxu0 %vm2165_vm0, %v2164_v0 }
0x1313   :  { %1995 = vmatmul.mubr.msk.bf16.vlgmr.msra.gmra.mxu1 %vm44_vm1, %v1361_v34 }
0x1314   :  { %2007 = vmatpush3.bf16.msra.mxu1 %v2160_v37  ;;  %2010 = vmatprep.mubr.msk.bf16.mxu1 %vm2165_vm0, %v2164_v0 }
0x1315   :  { %2008 = vmatprep.subr.bf16.mxu1 %v2164_v0  ;;  %2001 = vmatpush3.bf16.msra.mxu0 %v2161_v38 }
0x1318   :  { %2009 = vmatpush3.bf16.msra.mxu1 %v2162_v39 }
0x13cb   :  { %v1353_v40 = vpop.f32.mrf.mxu1 }
0x13cd   :  { %v1980_v41 = vpop.f32.mrf.mxu1 }
0x13ce   :  { %v1745_v41 = vld [vmem:[%s2655_s5] ss:$0 sm:$0xff]  ;;  %s2168_s5 = smov 96  }
0x13cf   :  { %v1356_v44 = vpop.f32.mrf.mxu1 }
0x13d0   :  { %v1399_v46 = vpop.f32.mrf.mxu0 }
0x13d1   :  { %v1981_v0 = vpop.f32.mrf.mxu1  ;;  %v1400_v48 = vadd.f32 %v1399_v46, %v1353_v40 }
0x13d2   :  { %v1988_v49 = vpop.f32.mrf.mxu0 }
0x13d3   :  { %v1405_v50 = vadd.f32 %v2337_v45, %v1400_v48  ;;  %v1467_v51 = vpop.f32.mrf.mxu1 }
0x13d4   :  { %v1473_v1 = vadd.f32 %v1467_v51, %v1432_v47  ;;  %v1402_v2 = vpop.f32.mrf.mxu0  ;;  %v17_v51 = vstv %s2656_s6 }
0x13d5   :  { %2129 = vtanh.f32 %v1405_v50  ;;  %v1996_v27 = vpop.f32.mrf.mxu1  ;;  %v1738_v29 = vmul.f32 -1.442695, %v1405_v50  ;;  %18 = vst [vmem:[#allocation4] sm:$0x1] %v17_v51 }
0x13d6   :  { %2131 = vtanh.f32 %v1473_v1  ;;  %v1989_v52 = vpop.f32.mrf.mxu0  ;;  %v1741_v43 = vmul.f32 -1.442695, %v1473_v1 }
0x13d7   :  { %v1470_v28 = vpop.f32.mrf.mxu1  ;;  %2133 = vpow2.f32 %v1738_v29 }
0x13d8   :  { %2135 = vpow2.f32 %v1741_v43 }
0x13d9   :  { %v1997_v53 = vpop.f32.mrf.mxu1 }
0x13e2   :  { %v2130_v54 = vpop.eup %2129 }
0x13e3   :  { %v2132_v55 = vpop.eup %2131  ;;  %1415 = vrot.lane.b32.xlu0 %v2130_v54, %s2166_s27  ;;  %v1746_v54 = vld [vmem:[#allocation4] ss:$0 sm:$0xff] }
0x13e4   :  { %1483 = vrot.lane.b32.xlu1 %v2132_v55, %s2166_s27  ;;  %v2134_v45 = vpop.eup %2133 }
0x13e5   :  { %v2136_v56 = vpop.eup %2135  ;;  %v1409_v57 = vadd.f32 1.0, %v2134_v45 }
0x13e6   :  { %v1477_v58 = vadd.f32 1.0, %v2136_v56 }
0x13e7   :  { %2137 = vrcp.f32 %v1409_v57 }
0x13e8   :  { %2139 = vrcp.f32 %v1477_v58 }
0x13f4   :  { %v2138_v59 = vpop.eup %2137 }
0x13f5   :  { %v2140_v60 = vpop.eup %2139  ;;  %v1413_v4 = vmul.f32 %v2138_v59, %v2550_v15 }
0x13f6   :  { %v1481_v62 = vmul.f32 %v2140_v60, %v2554_v19 }
0x1455   :  { %v1416_v30 = vpop.permute.xlu0 %1415 }
0x1456   :  { %v1484_v61 = vpop.permute.xlu1 %1483  ;;  %v1418_v63 = vmul.f32 %v2138_v59, %v1416_v30 }
0x1457   :  { %v1486_v3 = vmul.f32 %v2140_v60, %v1484_v61 }
0x1458   :  { %1420 = vrot.lane.b32.xlu0 %v1418_v63, %s2166_s27 }
0x1459   :  { %1488 = vrot.lane.b32.xlu1 %v1486_v3, %s2166_s27 }
0x14ca   :  { %v1421_v5 = vpop.permute.xlu0 %1420 }
0x14cb   :  { %v1489_v6 = vpop.permute.xlu1 %1488  ;;  %v1423_v7 = vadd.f32 %v1421_v5, %v1413_v4 }
0x14cc   :  { %v1491_v8 = vadd.f32 %v1489_v6, %v1481_v62 }
0x14cd   :  { %2141 = vtanh.f32 %v1423_v7 }
0x14ce   :  { %2143 = vtanh.f32 %v1491_v8 }
0x14da   :  { %v2142_v9 = vpop.eup %2141 }
0x14db   :  { %v2144_v10 = vpop.eup %2143  ;;  %1426 = vrot.lane.b32.xlu0 %v2142_v9, %s2166_s27 }
0x14dc   :  { %1494 = vrot.lane.b32.xlu1 %v2144_v10, %s2166_s27 }
0x154d   :  { %v1427_v11 = vpop.permute.xlu0 %1426 }
0x154e   :  { %v1495_v12 = vpop.permute.xlu1 %1494  ;;  %v1429_v13 = vmul.f32 %v2138_v59, %v1427_v11 }
0x154f   :  { %v1497_v14 = vmul.f32 %v2140_v60, %v1495_v12 }
0x1550   :  { %v1499_v16 = vpack.c.bf16 %v1429_v13, %v1429_v13 }
0x1551   :  { %v1498_v15 = vpack.c.bf16 %v1497_v14, %v1497_v14 }
0x1552   :  { %1501 = vrot.lane.b32.xlu0 %v1499_v16, %s2167_s18 }
0x1553   :  { %1547 = vrot.lane.b32.xlu1 %v1498_v15, %s2167_s18 }
0x15c4   :  { %v1502_v17 = vpop.permute.xlu0 %1501 }
0x15c5   :  { %v1548_v18 = vpop.permute.xlu1 %1547  ;;  %2003 = vmatmul.mubr.msk.bf16.vlgmr.msra.gmra.mxu0 %vm44_vm1, %v1502_v17 }
0x15c6   :  { %2011 = vmatmul.mubr.msk.bf16.vlgmr.msra.gmra.mxu1 %vm44_vm1, %v1548_v18 }
0x1685   :  { %v1540_v19 = vpop.f32.mrf.mxu0 }
0x1686   :  { %v1586_v21 = vpop.f32.mrf.mxu1 }
0x1687   :  { %v1587_v22 = vadd.f32 %v1586_v21, %v1540_v19  ;;  %v2004_v23 = vpop.f32.mrf.mxu0 }
0x1688   :  { %v2012_v24 = vpop.f32.mrf.mxu1 }
0x1689   :  { %v1592_v26 = vadd.f32 %v2163_v25, %v1587_v22  ;;  %v1543_v31 = vpop.f32.mrf.mxu0 }
0x168a   :  { %v1589_v32 = vpop.f32.mrf.mxu1 }
0x168b   :  { %2145 = vtanh.f32 %v1592_v26  ;;  %v2005_v33 = vpop.f32.mrf.mxu0  ;;  %v1744_v35 = vmul.f32 -1.442695, %v1592_v26 }
0x168c   :  { %v2013_v20 = vpop.f32.mrf.mxu1 }
0x168d   :  { %2147 = vpow2.f32 %v1744_v35 }
0x1698   :  { %v2146_v34 = vpop.eup %2145 }
0x1699   :  { %1602 = vrot.lane.b32.xlu0 %v2146_v34, %s2166_s27 }
0x169a   :  { %v2148_v36 = vpop.eup %2147 }
0x169b   :  { %v1596_v37 = vadd.f32 1.0, %v2148_v36 }
0x169d   :  { %2149 = vrcp.f32 %v1596_v37 }
0x16aa   :  { %v2150_v38 = vpop.eup %2149 }
0x16ab   :  { %v1600_v42 = vmul.f32 %v2150_v38, %v1423_v7 }
0x170b   :  { %v1603_v39 = vpop.permute.xlu0 %1602 }
0x170c   :  { %v1605_v40 = vmul.f32 %v2150_v38, %v1603_v39 }
0x170e   :  { %1607 = vrot.lane.b32.xlu1 %v1605_v40, %s2166_s27 }
0x1712   :  { %1646 = vrot.lane.b32.xlu1 %v1745_v41, %s2167_s18 }
0x1780   :  { %v1608_v44 = vpop.permute.xlu1 %1607 }
0x1781   :  { %v1610_v46 = vadd.f32 %v1608_v44, %v1600_v42 }
0x1783   :  { %2151 = vtanh.f32 %v1610_v46 }
0x1784   :  { %v1647_v48 = vpop.permute.xlu1 %1646 }
0x1790   :  { %v2152_v47 = vpop.eup %2151 }
0x1791   :  { %1613 = vrot.lane.b32.xlu0 %v2152_v47, %s2166_s27 }
0x1803   :  { %v1614_v0 = vpop.permute.xlu0 %1613 }
0x1804   :  { %v1616_v49 = vmul.f32 %v2150_v38, %v1614_v0 }
0x1806   :  { %v1649_v50 = vmul.f32 %v1647_v48, %v1616_v49 }
0x1808   :  { %1651 = vrot.lane.b32.xlu0 %v1649_v50, %s2167_s18 }
0x180c   :  { %1618 = vrot.lane.b32.xlu0 %v1497_v14, %s2167_s18 }
0x1810   :  { %1623 = vrot.lane.b32.xlu0 %v1616_v49, %s2167_s18 }
0x1814   :  { %1628 = vrot.lane.b32.xlu0 %v1491_v8, %s2168_s5 }
0x1818   :  { %1633 = vrot.lane.b32.xlu0 %v1610_v46, %s2168_s5 }
0x187a   :  { %v1652_v1 = vpop.permute.xlu0 %1651 }
0x187b   :  { %v1654_v2 = vsel %vm44_vm1, %v1652_v1, 0.0 }
0x187c   :  { %1655 = vadd.xlane.f32.xlu1 %v1654_v2 }
0x187e   :  { %v1619_v27 = vpop.permute.xlu0 %1618 }
0x187f   :  { %1621 = vst.msk [vmem:[#allocation2] sm:$0xff] %vm44_vm1, %v1619_v27  ;;  %1673 = vst.msk [vmem:[%s2657_s10] sm:$0xff] %vm44_vm1, %v1619_v27 }
0x1882   :  { %v1624_v52 = vpop.permute.xlu0 %1623 }
0x1883   :  { %1626 = vst.msk [vmem:[#allocation2 + $0x8] sm:$0xff] %vm44_vm1, %v1624_v52  ;;  %1748 = vst.msk [vmem:[%s2657_s10 + $0x8] sm:$0xff] %vm44_vm1, %v1624_v52 }
0x1886   :  { %v1629_v28 = vpop.permute.xlu0 %1628 }
0x1887   :  { %1631 = vst.msk [vmem:[#allocation3] sm:$0xff] %vm44_vm1, %v1629_v28  ;;  %1676 = vst.msk [vmem:[%s2658_s11] sm:$0xff] %vm44_vm1, %v1629_v28 }
0x188a   :  { %v1634_v53 = vpop.permute.xlu0 %1633 }
0x188b   :  { %1636 = vst.msk [vmem:[#allocation3 + $0x8] sm:$0xff] %vm44_vm1, %v1634_v53  ;;  %1749 = vst.msk [vmem:[%s2658_s11 + $0x8] sm:$0xff] %vm44_vm1, %v1634_v53 }
0x1905   :  { %v1656_v55 = vpop.xlane.xlu1 %1655 }
0x1906   :  { %v1664_v29 = vadd.f32 %v1746_v54, %v1656_v55 }
0x1908   :  { %v1747_v43 = vmul.f32 -1.442695, %v1664_v29 }
0x190a   :  { %2153 = vpow2.f32 %v1747_v43 }
0x1917   :  { %v2154_v45 = vpop.eup %2153 }
0x1918   :  { %v1668_v56 = vadd.f32 1.0, %v2154_v45 }
0x191a   :  { %2155 = vrcp.f32 %v1668_v56 }
0x1927   :  { %v2156_v57 = vpop.eup %2155 }
0x1928   :  { %1672 = vst.msk [vmem:[%s2659_s9] sm:$0xff] %vm1671_vm2, %v2156_v57 }

</bundles_post_ra>
